<compile_context>
chip_gen: v7x
topology: tpu7x:2x2x1
jax: 0.10.0
libtpu: 0.0.40
codegen_flags: <defaults>
</compile_context>

<pallas_src>
import math

import jax
import jax.numpy as jnp
from jax.experimental import pallas as pl
from jax.experimental.pallas import tpu as pltpu  # noqa: F401  (TPU backend)

# ------------------------- model hyper-parameters ---------------------------
ATOM_IN = 16          # config.atom_input_features (scaled down from 92)
FC = 32               # config.fc_features          (scaled down from 256)
OUT_FEATURES = 1      # config.output_features
CONV_LAYERS = 3       # config.conv_layers
RBF_VMIN, RBF_VMAX = -4.0, 4.0
RBF_BINS = FC
RBF_LENGTHSCALE = (RBF_VMAX - RBF_VMIN) / (RBF_BINS - 1)   # np.diff(centers).mean()
RBF_GAMMA = 1.0 / RBF_LENGTHSCALE
BN_EPS = 1e-5
LOG2 = math.log(2.0)

# packed parameter-vector slab layout (rows of a [VEC_ROWS, FC] f32 array)
ROW_ATOM_B = 0
ROW_EDGE_B = 1
ROW_CENTERS = 2
ROW_FC_B = 3
ROW_CONV_BASE = 4
ROWS_PER_CONV = 8      # b1f, b1n, b2f, b2n, bni_scale, bni_shift, bn_scale, bn_shift
VEC_ROWS_RAW = ROW_CONV_BASE + CONV_LAYERS * ROWS_PER_CONV
VEC_ROWS = ((VEC_ROWS_RAW + 7) // 8) * 8   # pad sublane dim to a multiple of 8


# ------------------------------ pallas kernel --------------------------------
def _silu(x):
    return x * jax.nn.sigmoid(x)


def potnet_fused_kernel(x_ref, d_ref, src_col_ref, tgt_col_ref, tgt_row_ref,
                        batch_row_ref, atom_w_ref, edge_w_ref,
                        w1f_ref, w2f_ref, w1n_ref, w2n_ref,
                        fc_w_ref, out_w_ref, out_b_ref, vec_ref, o_ref):
    """Entire PotNet_Ewald forward, VMEM-resident end to end."""
    f32 = jnp.float32
    n_nodes = x_ref.shape[0]
    n_edges = d_ref.shape[0]
    n_graphs = o_ref.shape[0]

    def vrow(r):                                   # one packed (1, FC) parameter row
        return vec_ref[r:r + 1, :]

    def mm(a, b):                                  # MXU matmul, f32 accumulation
        return jnp.dot(a, b, preferred_element_type=jnp.float32)

    # ---- edge_embedding: RBFExpansion(gaussian) -> Linear -> SiLU on -0.75/d
    # clamp only guards degenerate (<=0) distances; positive inputs are unchanged
    d = -0.75 / jnp.maximum(d_ref[...], 1e-12)                     # [E, 1]
    base = RBF_GAMMA * (d - vrow(ROW_CENTERS))                     # [E, RBF_BINS]
    rbf = jnp.exp(-(base * base))
    edge_feat = _silu(mm(rbf, edge_w_ref[...]) + vrow(ROW_EDGE_B))  # [E, FC]

    # ---- atom_embedding (charge_map == False)
    node = mm(x_ref[...], atom_w_ref[...]) + vrow(ROW_ATOM_B)       # [N, FC]

    # ---- gather / scatter / pool one-hots built once from int32 indices (no
    #      O(N*E) f32 ever touches HBM; re-used across all conv layers)
    e_by_n = jax.lax.broadcasted_iota(jnp.int32, (n_edges, n_nodes), 1)
    gat_tgt = jnp.where(e_by_n == tgt_col_ref[...], 1.0, 0.0)       # [E, N] -> x_i
    gat_src = jnp.where(e_by_n == src_col_ref[...], 1.0, 0.0)       # [E, N] -> x_j
    n_by_e = jax.lax.broadcasted_iota(jnp.int32, (n_nodes, n_edges), 0)
    scatter = jnp.where(n_by_e == tgt_row_ref[...], 1.0, 0.0)       # [N, E] sum-agg onto target
    g_by_n = jax.lax.broadcasted_iota(jnp.int32, (n_graphs, n_nodes), 0)
    pool = jnp.where(g_by_n == batch_row_ref[...], 1.0, 0.0)        # [B, N]
    pool = pool / jnp.maximum(jnp.sum(pool, axis=1, keepdims=True), 1.0)

    # ---- CONV_LAYERS x PotNetConv (statically unrolled; node features resident)
    for l in range(CONV_LAYERS):
        r = ROW_CONV_BASE + l * ROWS_PER_CONV
        xi = mm(gat_tgt, node)                                      # [E, FC]  x_i
        xj = mm(gat_src, node)                                      # [E, FC]  x_j
        w1f = w1f_ref[l]                                            # [3FC, FC]
        w1n = w1n_ref[l]                                            # [3FC, FC]

        # nonlinear_full(cat(x_i, x_j, e)) via K-split (cat never materialized)
        hf = (mm(xi, w1f[0:FC, :]) + mm(xj, w1f[FC:2 * FC, :])
              + mm(edge_feat, w1f[2 * FC:, :]) + vrow(r + 0))
        hf = mm(_silu(hf), w2f_ref[l]) + vrow(r + 2)
        # sigmoid(bn_interaction(.)) -- BatchNorm folded to eval-mode affine
        score = jax.nn.sigmoid(hf * vrow(r + 4) + vrow(r + 5))

        # nonlinear(cat(x_i, x_j, e)) via the same K-split
        hn = (mm(xi, w1n[0:FC, :]) + mm(xj, w1n[FC:2 * FC, :])
              + mm(edge_feat, w1n[2 * FC:, :]) + vrow(r + 1))
        hn = mm(_silu(hn), w2n_ref[l]) + vrow(r + 3)

        msg = score * hn                                            # [E, FC]
        agg = mm(scatter, msg)                                      # scatter-add -> [N, FC]
        # relu(x + bn(out)), bn folded to eval-mode affine
        node = jnp.maximum(node + agg * vrow(r + 6) + vrow(r + 7), 0.0)

    # ---- readout: global_mean_pool -> Linear + ShiftedSoftplus -> fc_out
    pooled = mm(pool, node)                                         # [B, FC]
    h = mm(pooled, fc_w_ref[...]) + vrow(ROW_FC_B)
    # overflow-safe softplus(h) - log(2)
    h = jnp.maximum(h, 0.0) + jnp.log(1.0 + jnp.exp(-jnp.abs(h))) - LOG2
    o_ref[...] = mm(h, out_w_ref[...]) + out_b_ref[...]             # [B, OUT_FEATURES]


# --------------------------- parameter construction -------------------------
def _init_linear(key, fan_in, fan_out):
    kw, kb = jax.random.split(key)
    bound = 1.0 / math.sqrt(fan_in)
    w = jax.random.uniform(kw, (fan_in, fan_out), jnp.float32, -bound, bound)
    b = jax.random.uniform(kb, (1, fan_out), jnp.float32, -bound, bound)
    return w, b


def _init_bn(key, feat):
    # BatchNorm1d folded to eval-mode affine: y = x*scale + shift
    # TODO(synk): PyTorch training-mode batch statistics are not reproduced; eval mode only.
    k1, k2, k3, k4 = jax.random.split(key, 4)
    weight = 1.0 + 0.1 * jax.random.normal(k1, (1, feat), jnp.float32)
    bias = 0.1 * jax.random.normal(k2, (1, feat), jnp.float32)
    running_mean = 0.1 * jax.random.normal(k3, (1, feat), jnp.float32)
    running_var = 1.0 + 0.1 * jnp.abs(jax.random.normal(k4, (1, feat), jnp.float32))
    scale = weight / jnp.sqrt(running_var + BN_EPS)
    shift = bias - running_mean * scale
    return scale, shift


def init_params(key):
    keys = jax.random.split(key, 4 + CONV_LAYERS)
    atom_w, atom_b = _init_linear(keys[0], ATOM_IN, FC)
    edge_w, edge_b = _init_linear(keys[1], RBF_BINS, FC)
    centers = jnp.linspace(RBF_VMIN, RBF_VMAX, RBF_BINS, dtype=jnp.float32)[None, :]
    fc_w, fc_b = _init_linear(keys[2 + CONV_LAYERS], FC, FC)
    out_w, out_b = _init_linear(keys[3 + CONV_LAYERS], FC, OUT_FEATURES)

    vec_rows = [atom_b, edge_b, centers, fc_b]        # rows 0..3
    w1f_l, w2f_l, w1n_l, w2n_l = [], [], [], []
    for l in range(CONV_LAYERS):
        k = jax.random.split(keys[2 + l], 6)
        w1f, b1f = _init_linear(k[0], 3 * FC, FC)     # nonlinear_full[0]
        w2f, b2f = _init_linear(k[1], FC, FC)         # nonlinear_full[2]
        w1n, b1n = _init_linear(k[2], 3 * FC, FC)     # nonlinear[0]
        w2n, b2n = _init_linear(k[3], FC, FC)         # nonlinear[2]
        bni_scale, bni_shift = _init_bn(k[4], FC)     # bn_interaction
        bn_scale, bn_shift = _init_bn(k[5], FC)       # bn
        w1f_l.append(w1f); w2f_l.append(w2f); w1n_l.append(w1n); w2n_l.append(w2n)
        vec_rows += [b1f, b1n, b2f, b2n, bni_scale, bni_shift, bn_scale, bn_shift]

    vec = jnp.concatenate(vec_rows, axis=0)
    pad = VEC_ROWS - vec.shape[0]
    if pad > 0:
        vec = jnp.concatenate([vec, jnp.zeros((pad, FC), jnp.float32)], axis=0)

    return dict(atom_w=atom_w, edge_w=edge_w,
                w1f=jnp.stack(w1f_l), w2f=jnp.stack(w2f_l),
                w1n=jnp.stack(w1n_l), w2n=jnp.stack(w2n_l),
                fc_w=fc_w, out_w=out_w, out_b=out_b, vec=vec)


# --------------------------------- forward ----------------------------------
def _zero_index_map(ndim):
    return lambda: (0,) * ndim


def potnet_ewald_forward(params, x, edge_index, edge_attr, batch, num_graphs):
    # PyG convention: edge_index[0] = source (x_j), edge_index[1] = target (x_i);
    # messages aggregate (sum) onto the target index.
    src = edge_index[0].astype(jnp.int32)
    tgt = edge_index[1].astype(jnp.int32)

    args = (
        x.astype(jnp.float32),                     # [N, ATOM_IN]
        edge_attr.astype(jnp.float32)[:, None],    # [E, 1]
        src[:, None],                              # [E, 1] int32
        tgt[:, None],                              # [E, 1] int32
        tgt[None, :],                              # [1, E] int32
        batch.astype(jnp.int32)[None, :],          # [1, N] int32
        params["atom_w"], params["edge_w"],
        params["w1f"], params["w2f"], params["w1n"], params["w2n"],
        params["fc_w"], params["out_w"], params["out_b"], params["vec"],
    )

    out = pl.pallas_call(
        potnet_fused_kernel,
        out_shape=jax.ShapeDtypeStruct((num_graphs, OUT_FEATURES), jnp.float32),
        in_specs=[pl.BlockSpec(a.shape, _zero_index_map(a.ndim)) for a in args],
        out_specs=pl.BlockSpec((num_graphs, OUT_FEATURES), _zero_index_map(2)),
    )(*args)
    return jnp.squeeze(out)   # torch.squeeze(self.fc_out(features))


# ----------------------------------- main ------------------------------------
if __name__ == "__main__":
    key = jax.random.PRNGKey(0)
    kp, kx, ke, ks, kt = jax.random.split(key, 5)

    N_NODES, N_EDGES, N_GRAPHS = 12, 24, 2

    params = init_params(kp)
    x = jax.random.normal(kx, (N_NODES, ATOM_IN), jnp.float32)              # data.x
    edge_attr = jax.random.uniform(ke, (N_EDGES,), jnp.float32, 0.5, 3.0)   # data.edge_attr (>0)
    src = jax.random.randint(ks, (N_EDGES,), 0, N_NODES)
    tgt = jax.random.randint(kt, (N_EDGES,), 0, N_NODES)
    edge_index = jnp.stack([src, tgt], axis=0)                              # data.edge_index
    batch = jnp.concatenate([jnp.zeros(N_NODES // 2, jnp.int32),
                             jnp.ones(N_NODES - N_NODES // 2, jnp.int32)])  # data.batch

    out = potnet_ewald_forward(params, x, edge_index, edge_attr, batch, N_GRAPHS)
    out = jax.block_until_ready(out)
    assert out.shape == (N_GRAPHS,), out.shape
    assert bool(jnp.all(jnp.isfinite(out)))
    print("KERNEL_OK")
</pallas_src>

<mosaic_0001>
module attributes {stable_mosaic.version = 11 : i64} {
  func.func @potnet_fused_kernel(%arg0: memref<12x16xf32, #tpu.memory_space<vmem>>, %arg1: memref<24x1xf32, #tpu.memory_space<vmem>>, %arg2: memref<24x1xi32, #tpu.memory_space<vmem>>, %arg3: memref<24x1xi32, #tpu.memory_space<vmem>>, %arg4: memref<1x24xi32, #tpu.memory_space<vmem>>, %arg5: memref<1x12xi32, #tpu.memory_space<vmem>>, %arg6: memref<16x32xf32, #tpu.memory_space<vmem>>, %arg7: memref<32x32xf32, #tpu.memory_space<vmem>>, %arg8: memref<3x96x32xf32, #tpu.memory_space<vmem>>, %arg9: memref<3x32x32xf32, #tpu.memory_space<vmem>>, %arg10: memref<3x96x32xf32, #tpu.memory_space<vmem>>, %arg11: memref<3x32x32xf32, #tpu.memory_space<vmem>>, %arg12: memref<32x32xf32, #tpu.memory_space<vmem>>, %arg13: memref<32x1xf32, #tpu.memory_space<vmem>>, %arg14: memref<1x1xf32, #tpu.memory_space<vmem>>, %arg15: memref<32x32xf32, #tpu.memory_space<vmem>>, %arg16: memref<2x1xf32, #tpu.memory_space<vmem>>) attributes {dimension_semantics = [], scalar_prefetch = 0 : i64, scratch_operands = 0 : i64, tpu.core_type = #tpu.core_type<tc>} {
    %c0 = arith.constant 0 : index
    %c0_0 = arith.constant 0 : index
    %0 = vector.load %arg1[%c0, %c0_0] : memref<24x1xf32, #tpu.memory_space<vmem>>, vector<24x1xf32>
    %cst = arith.constant 9.99999996E-13 : f32
    %1 = vector.broadcast %cst : f32 to vector<24x1xf32>
    %2 = arith.maximumf %0, %1 : vector<24x1xf32>
    %cst_1 = arith.constant -7.500000e-01 : f32
    %3 = vector.broadcast %cst_1 : f32 to vector<24x1xf32>
    %4 = arith.divf %3, %2 : vector<24x1xf32>
    %c2 = arith.constant 2 : index
    %c0_2 = arith.constant 0 : index
    %5 = vector.load %arg15[%c2, %c0_2] : memref<32x32xf32, #tpu.memory_space<vmem>>, vector<1x32xf32>
    %6 = vector.broadcast %4 : vector<24x1xf32> to vector<24x32xf32>
    %7 = vector.broadcast %5 : vector<1x32xf32> to vector<24x32xf32>
    %8 = arith.subf %6, %7 : vector<24x32xf32>
    %cst_3 = arith.constant 3.875000e+00 : f32
    %9 = vector.broadcast %cst_3 : f32 to vector<24x32xf32>
    %10 = arith.mulf %9, %8 : vector<24x32xf32>
    %11 = arith.mulf %10, %10 : vector<24x32xf32>
    %cst_4 = arith.constant 0.000000e+00 : f32
    %12 = vector.broadcast %cst_4 : f32 to vector<24x32xf32>
    %13 = arith.subf %12, %11 : vector<24x32xf32>
    %14 = math.exp %13 : vector<24x32xf32>
    %c0_5 = arith.constant 0 : index
    %c0_6 = arith.constant 0 : index
    %15 = vector.load %arg7[%c0_5, %c0_6] : memref<32x32xf32, #tpu.memory_space<vmem>>, vector<32x32xf32>
    %cst_7 = arith.constant dense<0.000000e+00> : vector<24x32xf32>
    %16 = tpu.matmul %14, %15, %cst_7 {dimension_numbers = #tpu.dot_dimension_numbers<[1], [0], [0], [1], [0, 0, 1, 1], [], []>} : vector<24x32xf32>, vector<32x32xf32>, vector<24x32xf32> -> vector<24x32xf32>
    %c1 = arith.constant 1 : index
    %c0_8 = arith.constant 0 : index
    %17 = vector.load %arg15[%c1, %c0_8] : memref<32x32xf32, #tpu.memory_space<vmem>>, vector<1x32xf32>
    %18 = vector.broadcast %17 : vector<1x32xf32> to vector<24x32xf32>
    %19 = arith.addf %16, %18 : vector<24x32xf32>
    %20 = arith.negf %19 : vector<24x32xf32>
    %21 = math.exp %20 : vector<24x32xf32>
    %cst_9 = arith.constant 1.000000e+00 : f32
    %22 = vector.broadcast %cst_9 : f32 to vector<24x32xf32>
    %23 = arith.addf %22, %21 : vector<24x32xf32>
    %24 = arith.divf %22, %23 : vector<24x32xf32>
    %25 = arith.mulf %19, %24 : vector<24x32xf32>
    %c0_10 = arith.constant 0 : index
    %c0_11 = arith.constant 0 : index
    %26 = vector.load %arg0[%c0_10, %c0_11] : memref<12x16xf32, #tpu.memory_space<vmem>>, vector<12x16xf32>
    %c0_12 = arith.constant 0 : index
    %c0_13 = arith.constant 0 : index
    %27 = vector.load %arg6[%c0_12, %c0_13] : memref<16x32xf32, #tpu.memory_space<vmem>>, vector<16x32xf32>
    %cst_14 = arith.constant dense<0.000000e+00> : vector<12x32xf32>
    %28 = tpu.matmul %26, %27, %cst_14 {dimension_numbers = #tpu.dot_dimension_numbers<[1], [0], [0], [1], [0, 0, 1, 1], [], []>} : vector<12x16xf32>, vector<16x32xf32>, vector<12x32xf32> -> vector<12x32xf32>
    %c0_15 = arith.constant 0 : index
    %c0_16 = arith.constant 0 : index
    %29 = vector.load %arg15[%c0_15, %c0_16] : memref<32x32xf32, #tpu.memory_space<vmem>>, vector<1x32xf32>
    %30 = vector.broadcast %29 : vector<1x32xf32> to vector<12x32xf32>
    %31 = arith.addf %28, %30 : vector<12x32xf32>
    %32 = tpu.iota {dimensions = array<i32: 1>} : vector<24x12xi32>
    %c0_17 = arith.constant 0 : index
    %c0_18 = arith.constant 0 : index
    %33 = vector.load %arg3[%c0_17, %c0_18] : memref<24x1xi32, #tpu.memory_space<vmem>>, vector<24x1xi32>
    %34 = vector.broadcast %33 : vector<24x1xi32> to vector<24x12xi32>
    %35 = arith.cmpi eq, %32, %34 : vector<24x12xi32>
    %cst_19 = arith.constant 1.000000e+00 : f32
    %cst_20 = arith.constant 0.000000e+00 : f32
    %36 = vector.broadcast %cst_19 : f32 to vector<24x12xf32>
    %37 = vector.broadcast %cst_20 : f32 to vector<24x12xf32>
    %38 = arith.select %35, %36, %37 : vector<24x12xi1>, vector<24x12xf32>
    %c0_21 = arith.constant 0 : index
    %c0_22 = arith.constant 0 : index
    %39 = vector.load %arg2[%c0_21, %c0_22] : memref<24x1xi32, #tpu.memory_space<vmem>>, vector<24x1xi32>
    %40 = vector.broadcast %39 : vector<24x1xi32> to vector<24x12xi32>
    %41 = arith.cmpi eq, %32, %40 : vector<24x12xi32>
    %cst_23 = arith.constant 1.000000e+00 : f32
    %cst_24 = arith.constant 0.000000e+00 : f32
    %42 = vector.broadcast %cst_23 : f32 to vector<24x12xf32>
    %43 = vector.broadcast %cst_24 : f32 to vector<24x12xf32>
    %44 = arith.select %41, %42, %43 : vector<24x12xi1>, vector<24x12xf32>
    %45 = tpu.iota {dimensions = array<i32: 0>} : vector<12x24xi32>
    %c0_25 = arith.constant 0 : index
    %c0_26 = arith.constant 0 : index
    %46 = vector.load %arg4[%c0_25, %c0_26] : memref<1x24xi32, #tpu.memory_space<vmem>>, vector<1x24xi32>
    %47 = vector.broadcast %46 : vector<1x24xi32> to vector<12x24xi32>
    %48 = arith.cmpi eq, %45, %47 : vector<12x24xi32>
    %cst_27 = arith.constant 1.000000e+00 : f32
    %cst_28 = arith.constant 0.000000e+00 : f32
    %49 = vector.broadcast %cst_27 : f32 to vector<12x24xf32>
    %50 = vector.broadcast %cst_28 : f32 to vector<12x24xf32>
    %51 = arith.select %48, %49, %50 : vector<12x24xi1>, vector<12x24xf32>
    %52 = tpu.iota {dimensions = array<i32: 0>} : vector<2x12xi32>
    %c0_29 = arith.constant 0 : index
    %c0_30 = arith.constant 0 : index
    %53 = vector.load %arg5[%c0_29, %c0_30] : memref<1x12xi32, #tpu.memory_space<vmem>>, vector<1x12xi32>
    %54 = vector.broadcast %53 : vector<1x12xi32> to vector<2x12xi32>
    %55 = arith.cmpi eq, %52, %54 : vector<2x12xi32>
    %cst_31 = arith.constant 1.000000e+00 : f32
    %cst_32 = arith.constant 0.000000e+00 : f32
    %56 = vector.broadcast %cst_31 : f32 to vector<2x12xf32>
    %57 = vector.broadcast %cst_32 : f32 to vector<2x12xf32>
    %58 = arith.select %55, %56, %57 : vector<2x12xi1>, vector<2x12xf32>
    %cst_33 = arith.constant dense<0.000000e+00> : vector<2xf32>
    %59 = vector.multi_reduction <add>, %58, %cst_33 [1] : vector<2x12xf32> to vector<2xf32>
    %60 = vector.shape_cast %59 : vector<2xf32> to vector<2x1xf32>
    %cst_34 = arith.constant 1.000000e+00 : f32
    %61 = vector.broadcast %cst_34 : f32 to vector<2x1xf32>
    %62 = arith.maximumf %60, %61 : vector<2x1xf32>
    %63 = vector.broadcast %62 : vector<2x1xf32> to vector<2x12xf32>
    %64 = arith.divf %58, %63 : vector<2x12xf32>
    %cst_35 = arith.constant dense<0.000000e+00> : vector<24x32xf32>
    %65 = tpu.matmul %38, %31, %cst_35 {dimension_numbers = #tpu.dot_dimension_numbers<[1], [0], [0], [1], [0, 0, 1, 1], [], []>} : vector<24x12xf32>, vector<12x32xf32>, vector<24x32xf32> -> vector<24x32xf32>
    %cst_36 = arith.constant dense<0.000000e+00> : vector<24x32xf32>
    %66 = tpu.matmul %44, %31, %cst_36 {dimension_numbers = #tpu.dot_dimension_numbers<[1], [0], [0], [1], [0, 0, 1, 1], [], []>} : vector<24x12xf32>, vector<12x32xf32>, vector<24x32xf32> -> vector<24x32xf32>
    %c0_37 = arith.constant 0 : index
    %c0_38 = arith.constant 0 : index
    %c0_39 = arith.constant 0 : index
    %67 = vector.load %arg8[%c0_37, %c0_38, %c0_39] : memref<3x96x32xf32, #tpu.memory_space<vmem>>, vector<1x96x32xf32>
    %68 = vector.shape_cast %67 : vector<1x96x32xf32> to vector<96x32xf32>
    %c0_40 = arith.constant 0 : index
    %c0_41 = arith.constant 0 : index
    %c0_42 = arith.constant 0 : index
    %69 = vector.load %arg10[%c0_40, %c0_41, %c0_42] : memref<3x96x32xf32, #tpu.memory_space<vmem>>, vector<1x96x32xf32>
    %70 = vector.shape_cast %69 : vector<1x96x32xf32> to vector<96x32xf32>
    %71 = vector.extract_strided_slice %68 {offsets = [0, 0], sizes = [32, 32], strides = [1, 1]} : vector<96x32xf32> to vector<32x32xf32>
    %cst_43 = arith.constant dense<0.000000e+00> : vector<24x32xf32>
    %72 = tpu.matmul %65, %71, %cst_43 {dimension_numbers = #tpu.dot_dimension_numbers<[1], [0], [0], [1], [0, 0, 1, 1], [], []>} : vector<24x32xf32>, vector<32x32xf32>, vector<24x32xf32> -> vector<24x32xf32>
    %73 = vector.extract_strided_slice %68 {offsets = [32, 0], sizes = [32, 32], strides = [1, 1]} : vector<96x32xf32> to vector<32x32xf32>
    %cst_44 = arith.constant dense<0.000000e+00> : vector<24x32xf32>
    %74 = tpu.matmul %66, %73, %cst_44 {dimension_numbers = #tpu.dot_dimension_numbers<[1], [0], [0], [1], [0, 0, 1, 1], [], []>} : vector<24x32xf32>, vector<32x32xf32>, vector<24x32xf32> -> vector<24x32xf32>
    %75 = arith.addf %72, %74 : vector<24x32xf32>
    %76 = vector.extract_strided_slice %68 {offsets = [64, 0], sizes = [32, 32], strides = [1, 1]} : vector<96x32xf32> to vector<32x32xf32>
    %cst_45 = arith.constant dense<0.000000e+00> : vector<24x32xf32>
    %77 = tpu.matmul %25, %76, %cst_45 {dimension_numbers = #tpu.dot_dimension_numbers<[1], [0], [0], [1], [0, 0, 1, 1], [], []>} : vector<24x32xf32>, vector<32x32xf32>, vector<24x32xf32> -> vector<24x32xf32>
    %78 = arith.addf %75, %77 : vector<24x32xf32>
    %c4 = arith.constant 4 : index
    %c0_46 = arith.constant 0 : index
    %79 = vector.load %arg15[%c4, %c0_46] : memref<32x32xf32, #tpu.memory_space<vmem>>, vector<1x32xf32>
    %80 = vector.broadcast %79 : vector<1x32xf32> to vector<24x32xf32>
    %81 = arith.addf %78, %80 : vector<24x32xf32>
    %82 = arith.negf %81 : vector<24x32xf32>
    %83 = math.exp %82 : vector<24x32xf32>
    %cst_47 = arith.constant 1.000000e+00 : f32
    %84 = vector.broadcast %cst_47 : f32 to vector<24x32xf32>
    %85 = arith.addf %84, %83 : vector<24x32xf32>
    %86 = arith.divf %84, %85 : vector<24x32xf32>
    %87 = arith.mulf %81, %86 : vector<24x32xf32>
    %c0_48 = arith.constant 0 : index
    %c0_49 = arith.constant 0 : index
    %c0_50 = arith.constant 0 : index
    %88 = vector.load %arg9[%c0_48, %c0_49, %c0_50] : memref<3x32x32xf32, #tpu.memory_space<vmem>>, vector<1x32x32xf32>
    %89 = vector.shape_cast %88 : vector<1x32x32xf32> to vector<32x32xf32>
    %cst_51 = arith.constant dense<0.000000e+00> : vector<24x32xf32>
    %90 = tpu.matmul %87, %89, %cst_51 {dimension_numbers = #tpu.dot_dimension_numbers<[1], [0], [0], [1], [0, 0, 1, 1], [], []>} : vector<24x32xf32>, vector<32x32xf32>, vector<24x32xf32> -> vector<24x32xf32>
    %c6 = arith.constant 6 : index
    %c0_52 = arith.constant 0 : index
    %91 = vector.load %arg15[%c6, %c0_52] : memref<32x32xf32, #tpu.memory_space<vmem>>, vector<1x32xf32>
    %92 = vector.broadcast %91 : vector<1x32xf32> to vector<24x32xf32>
    %93 = arith.addf %90, %92 : vector<24x32xf32>
    %c8 = arith.constant 8 : index
    %c0_53 = arith.constant 0 : index
    %94 = vector.load %arg15[%c8, %c0_53] : memref<32x32xf32, #tpu.memory_space<vmem>>, vector<1x32xf32>
    %95 = vector.broadcast %94 : vector<1x32xf32> to vector<24x32xf32>
    %96 = arith.mulf %93, %95 : vector<24x32xf32>
    %c9 = arith.constant 9 : index
    %c0_54 = arith.constant 0 : index
    %97 = vector.load %arg15[%c9, %c0_54] : memref<32x32xf32, #tpu.memory_space<vmem>>, vector<1x32xf32>
    %98 = vector.broadcast %97 : vector<1x32xf32> to vector<24x32xf32>
    %99 = arith.addf %96, %98 : vector<24x32xf32>
    %100 = arith.negf %99 : vector<24x32xf32>
    %101 = math.exp %100 : vector<24x32xf32>
    %cst_55 = arith.constant 1.000000e+00 : f32
    %102 = vector.broadcast %cst_55 : f32 to vector<24x32xf32>
    %103 = arith.addf %102, %101 : vector<24x32xf32>
    %104 = arith.divf %102, %103 : vector<24x32xf32>
    %105 = vector.extract_strided_slice %70 {offsets = [0, 0], sizes = [32, 32], strides = [1, 1]} : vector<96x32xf32> to vector<32x32xf32>
    %cst_56 = arith.constant dense<0.000000e+00> : vector<24x32xf32>
    %106 = tpu.matmul %65, %105, %cst_56 {dimension_numbers = #tpu.dot_dimension_numbers<[1], [0], [0], [1], [0, 0, 1, 1], [], []>} : vector<24x32xf32>, vector<32x32xf32>, vector<24x32xf32> -> vector<24x32xf32>
    %107 = vector.extract_strided_slice %70 {offsets = [32, 0], sizes = [32, 32], strides = [1, 1]} : vector<96x32xf32> to vector<32x32xf32>
    %cst_57 = arith.constant dense<0.000000e+00> : vector<24x32xf32>
    %108 = tpu.matmul %66, %107, %cst_57 {dimension_numbers = #tpu.dot_dimension_numbers<[1], [0], [0], [1], [0, 0, 1, 1], [], []>} : vector<24x32xf32>, vector<32x32xf32>, vector<24x32xf32> -> vector<24x32xf32>
    %109 = arith.addf %106, %108 : vector<24x32xf32>
    %110 = vector.extract_strided_slice %70 {offsets = [64, 0], sizes = [32, 32], strides = [1, 1]} : vector<96x32xf32> to vector<32x32xf32>
    %cst_58 = arith.constant dense<0.000000e+00> : vector<24x32xf32>
    %111 = tpu.matmul %25, %110, %cst_58 {dimension_numbers = #tpu.dot_dimension_numbers<[1], [0], [0], [1], [0, 0, 1, 1], [], []>} : vector<24x32xf32>, vector<32x32xf32>, vector<24x32xf32> -> vector<24x32xf32>
    %112 = arith.addf %109, %111 : vector<24x32xf32>
    %c5 = arith.constant 5 : index
    %c0_59 = arith.constant 0 : index
    %113 = vector.load %arg15[%c5, %c0_59] : memref<32x32xf32, #tpu.memory_space<vmem>>, vector<1x32xf32>
    %114 = vector.broadcast %113 : vector<1x32xf32> to vector<24x32xf32>
    %115 = arith.addf %112, %114 : vector<24x32xf32>
    %116 = arith.negf %115 : vector<24x32xf32>
    %117 = math.exp %116 : vector<24x32xf32>
    %cst_60 = arith.constant 1.000000e+00 : f32
    %118 = vector.broadcast %cst_60 : f32 to vector<24x32xf32>
    %119 = arith.addf %118, %117 : vector<24x32xf32>
    %120 = arith.divf %118, %119 : vector<24x32xf32>
    %121 = arith.mulf %115, %120 : vector<24x32xf32>
    %c0_61 = arith.constant 0 : index
    %c0_62 = arith.constant 0 : index
    %c0_63 = arith.constant 0 : index
    %122 = vector.load %arg11[%c0_61, %c0_62, %c0_63] : memref<3x32x32xf32, #tpu.memory_space<vmem>>, vector<1x32x32xf32>
    %123 = vector.shape_cast %122 : vector<1x32x32xf32> to vector<32x32xf32>
    %cst_64 = arith.constant dense<0.000000e+00> : vector<24x32xf32>
    %124 = tpu.matmul %121, %123, %cst_64 {dimension_numbers = #tpu.dot_dimension_numbers<[1], [0], [0], [1], [0, 0, 1, 1], [], []>} : vector<24x32xf32>, vector<32x32xf32>, vector<24x32xf32> -> vector<24x32xf32>
    %c7 = arith.constant 7 : index
    %c0_65 = arith.constant 0 : index
    %125 = vector.load %arg15[%c7, %c0_65] : memref<32x32xf32, #tpu.memory_space<vmem>>, vector<1x32xf32>
    %126 = vector.broadcast %125 : vector<1x32xf32> to vector<24x32xf32>
    %127 = arith.addf %124, %126 : vector<24x32xf32>
    %128 = arith.mulf %104, %127 : vector<24x32xf32>
    %cst_66 = arith.constant dense<0.000000e+00> : vector<12x32xf32>
    %129 = tpu.matmul %51, %128, %cst_66 {dimension_numbers = #tpu.dot_dimension_numbers<[1], [0], [0], [1], [0, 0, 1, 1], [], []>} : vector<12x24xf32>, vector<24x32xf32>, vector<12x32xf32> -> vector<12x32xf32>
    %c10 = arith.constant 10 : index
    %c0_67 = arith.constant 0 : index
    %130 = vector.load %arg15[%c10, %c0_67] : memref<32x32xf32, #tpu.memory_space<vmem>>, vector<1x32xf32>
    %131 = vector.broadcast %130 : vector<1x32xf32> to vector<12x32xf32>
    %132 = arith.mulf %129, %131 : vector<12x32xf32>
    %133 = arith.addf %31, %132 : vector<12x32xf32>
    %c11 = arith.constant 11 : index
    %c0_68 = arith.constant 0 : index
    %134 = vector.load %arg15[%c11, %c0_68] : memref<32x32xf32, #tpu.memory_space<vmem>>, vector<1x32xf32>
    %135 = vector.broadcast %134 : vector<1x32xf32> to vector<12x32xf32>
    %136 = arith.addf %133, %135 : vector<12x32xf32>
    %cst_69 = arith.constant 0.000000e+00 : f32
    %137 = vector.broadcast %cst_69 : f32 to vector<12x32xf32>
    %138 = arith.maximumf %136, %137 : vector<12x32xf32>
    %cst_70 = arith.constant dense<0.000000e+00> : vector<24x32xf32>
    %139 = tpu.matmul %38, %138, %cst_70 {dimension_numbers = #tpu.dot_dimension_numbers<[1], [0], [0], [1], [0, 0, 1, 1], [], []>} : vector<24x12xf32>, vector<12x32xf32>, vector<24x32xf32> -> vector<24x32xf32>
    %cst_71 = arith.constant dense<0.000000e+00> : vector<24x32xf32>
    %140 = tpu.matmul %44, %138, %cst_71 {dimension_numbers = #tpu.dot_dimension_numbers<[1], [0], [0], [1], [0, 0, 1, 1], [], []>} : vector<24x12xf32>, vector<12x32xf32>, vector<24x32xf32> -> vector<24x32xf32>
    %c1_72 = arith.constant 1 : index
    %c0_73 = arith.constant 0 : index
    %c0_74 = arith.constant 0 : index
    %141 = vector.load %arg8[%c1_72, %c0_73, %c0_74] : memref<3x96x32xf32, #tpu.memory_space<vmem>>, vector<1x96x32xf32>
    %142 = vector.shape_cast %141 : vector<1x96x32xf32> to vector<96x32xf32>
    %c1_75 = arith.constant 1 : index
    %c0_76 = arith.constant 0 : index
    %c0_77 = arith.constant 0 : index
    %143 = vector.load %arg10[%c1_75, %c0_76, %c0_77] : memref<3x96x32xf32, #tpu.memory_space<vmem>>, vector<1x96x32xf32>
    %144 = vector.shape_cast %143 : vector<1x96x32xf32> to vector<96x32xf32>
    %145 = vector.extract_strided_slice %142 {offsets = [0, 0], sizes = [32, 32], strides = [1, 1]} : vector<96x32xf32> to vector<32x32xf32>
    %cst_78 = arith.constant dense<0.000000e+00> : vector<24x32xf32>
    %146 = tpu.matmul %139, %145, %cst_78 {dimension_numbers = #tpu.dot_dimension_numbers<[1], [0], [0], [1], [0, 0, 1, 1], [], []>} : vector<24x32xf32>, vector<32x32xf32>, vector<24x32xf32> -> vector<24x32xf32>
    %147 = vector.extract_strided_slice %142 {offsets = [32, 0], sizes = [32, 32], strides = [1, 1]} : vector<96x32xf32> to vector<32x32xf32>
    %cst_79 = arith.constant dense<0.000000e+00> : vector<24x32xf32>
    %148 = tpu.matmul %140, %147, %cst_79 {dimension_numbers = #tpu.dot_dimension_numbers<[1], [0], [0], [1], [0, 0, 1, 1], [], []>} : vector<24x32xf32>, vector<32x32xf32>, vector<24x32xf32> -> vector<24x32xf32>
    %149 = arith.addf %146, %148 : vector<24x32xf32>
    %150 = vector.extract_strided_slice %142 {offsets = [64, 0], sizes = [32, 32], strides = [1, 1]} : vector<96x32xf32> to vector<32x32xf32>
    %cst_80 = arith.constant dense<0.000000e+00> : vector<24x32xf32>
    %151 = tpu.matmul %25, %150, %cst_80 {dimension_numbers = #tpu.dot_dimension_numbers<[1], [0], [0], [1], [0, 0, 1, 1], [], []>} : vector<24x32xf32>, vector<32x32xf32>, vector<24x32xf32> -> vector<24x32xf32>
    %152 = arith.addf %149, %151 : vector<24x32xf32>
    %c12 = arith.constant 12 : index
    %c0_81 = arith.constant 0 : index
    %153 = vector.load %arg15[%c12, %c0_81] : memref<32x32xf32, #tpu.memory_space<vmem>>, vector<1x32xf32>
    %154 = vector.broadcast %153 : vector<1x32xf32> to vector<24x32xf32>
    %155 = arith.addf %152, %154 : vector<24x32xf32>
    %156 = arith.negf %155 : vector<24x32xf32>
    %157 = math.exp %156 : vector<24x32xf32>
    %cst_82 = arith.constant 1.000000e+00 : f32
    %158 = vector.broadcast %cst_82 : f32 to vector<24x32xf32>
    %159 = arith.addf %158, %157 : vector<24x32xf32>
    %160 = arith.divf %158, %159 : vector<24x32xf32>
    %161 = arith.mulf %155, %160 : vector<24x32xf32>
    %c1_83 = arith.constant 1 : index
    %c0_84 = arith.constant 0 : index
    %c0_85 = arith.constant 0 : index
    %162 = vector.load %arg9[%c1_83, %c0_84, %c0_85] : memref<3x32x32xf32, #tpu.memory_space<vmem>>, vector<1x32x32xf32>
    %163 = vector.shape_cast %162 : vector<1x32x32xf32> to vector<32x32xf32>
    %cst_86 = arith.constant dense<0.000000e+00> : vector<24x32xf32>
    %164 = tpu.matmul %161, %163, %cst_86 {dimension_numbers = #tpu.dot_dimension_numbers<[1], [0], [0], [1], [0, 0, 1, 1], [], []>} : vector<24x32xf32>, vector<32x32xf32>, vector<24x32xf32> -> vector<24x32xf32>
    %c14 = arith.constant 14 : index
    %c0_87 = arith.constant 0 : index
    %165 = vector.load %arg15[%c14, %c0_87] : memref<32x32xf32, #tpu.memory_space<vmem>>, vector<1x32xf32>
    %166 = vector.broadcast %165 : vector<1x32xf32> to vector<24x32xf32>
    %167 = arith.addf %164, %166 : vector<24x32xf32>
    %c16 = arith.constant 16 : index
    %c0_88 = arith.constant 0 : index
    %168 = vector.load %arg15[%c16, %c0_88] : memref<32x32xf32, #tpu.memory_space<vmem>>, vector<1x32xf32>
    %169 = vector.broadcast %168 : vector<1x32xf32> to vector<24x32xf32>
    %170 = arith.mulf %167, %169 : vector<24x32xf32>
    %c17 = arith.constant 17 : index
    %c0_89 = arith.constant 0 : index
    %171 = vector.load %arg15[%c17, %c0_89] : memref<32x32xf32, #tpu.memory_space<vmem>>, vector<1x32xf32>
    %172 = vector.broadcast %171 : vector<1x32xf32> to vector<24x32xf32>
    %173 = arith.addf %170, %172 : vector<24x32xf32>
    %174 = arith.negf %173 : vector<24x32xf32>
    %175 = math.exp %174 : vector<24x32xf32>
    %cst_90 = arith.constant 1.000000e+00 : f32
    %176 = vector.broadcast %cst_90 : f32 to vector<24x32xf32>
    %177 = arith.addf %176, %175 : vector<24x32xf32>
    %178 = arith.divf %176, %177 : vector<24x32xf32>
    %179 = vector.extract_strided_slice %144 {offsets = [0, 0], sizes = [32, 32], strides = [1, 1]} : vector<96x32xf32> to vector<32x32xf32>
    %cst_91 = arith.constant dense<0.000000e+00> : vector<24x32xf32>
    %180 = tpu.matmul %139, %179, %cst_91 {dimension_numbers = #tpu.dot_dimension_numbers<[1], [0], [0], [1], [0, 0, 1, 1], [], []>} : vector<24x32xf32>, vector<32x32xf32>, vector<24x32xf32> -> vector<24x32xf32>
    %181 = vector.extract_strided_slice %144 {offsets = [32, 0], sizes = [32, 32], strides = [1, 1]} : vector<96x32xf32> to vector<32x32xf32>
    %cst_92 = arith.constant dense<0.000000e+00> : vector<24x32xf32>
    %182 = tpu.matmul %140, %181, %cst_92 {dimension_numbers = #tpu.dot_dimension_numbers<[1], [0], [0], [1], [0, 0, 1, 1], [], []>} : vector<24x32xf32>, vector<32x32xf32>, vector<24x32xf32> -> vector<24x32xf32>
    %183 = arith.addf %180, %182 : vector<24x32xf32>
    %184 = vector.extract_strided_slice %144 {offsets = [64, 0], sizes = [32, 32], strides = [1, 1]} : vector<96x32xf32> to vector<32x32xf32>
    %cst_93 = arith.constant dense<0.000000e+00> : vector<24x32xf32>
    %185 = tpu.matmul %25, %184, %cst_93 {dimension_numbers = #tpu.dot_dimension_numbers<[1], [0], [0], [1], [0, 0, 1, 1], [], []>} : vector<24x32xf32>, vector<32x32xf32>, vector<24x32xf32> -> vector<24x32xf32>
    %186 = arith.addf %183, %185 : vector<24x32xf32>
    %c13 = arith.constant 13 : index
    %c0_94 = arith.constant 0 : index
    %187 = vector.load %arg15[%c13, %c0_94] : memref<32x32xf32, #tpu.memory_space<vmem>>, vector<1x32xf32>
    %188 = vector.broadcast %187 : vector<1x32xf32> to vector<24x32xf32>
    %189 = arith.addf %186, %188 : vector<24x32xf32>
    %190 = arith.negf %189 : vector<24x32xf32>
    %191 = math.exp %190 : vector<24x32xf32>
    %cst_95 = arith.constant 1.000000e+00 : f32
    %192 = vector.broadcast %cst_95 : f32 to vector<24x32xf32>
    %193 = arith.addf %192, %191 : vector<24x32xf32>
    %194 = arith.divf %192, %193 : vector<24x32xf32>
    %195 = arith.mulf %189, %194 : vector<24x32xf32>
    %c1_96 = arith.constant 1 : index
    %c0_97 = arith.constant 0 : index
    %c0_98 = arith.constant 0 : index
    %196 = vector.load %arg11[%c1_96, %c0_97, %c0_98] : memref<3x32x32xf32, #tpu.memory_space<vmem>>, vector<1x32x32xf32>
    %197 = vector.shape_cast %196 : vector<1x32x32xf32> to vector<32x32xf32>
    %cst_99 = arith.constant dense<0.000000e+00> : vector<24x32xf32>
    %198 = tpu.matmul %195, %197, %cst_99 {dimension_numbers = #tpu.dot_dimension_numbers<[1], [0], [0], [1], [0, 0, 1, 1], [], []>} : vector<24x32xf32>, vector<32x32xf32>, vector<24x32xf32> -> vector<24x32xf32>
    %c15 = arith.constant 15 : index
    %c0_100 = arith.constant 0 : index
    %199 = vector.load %arg15[%c15, %c0_100] : memref<32x32xf32, #tpu.memory_space<vmem>>, vector<1x32xf32>
    %200 = vector.broadcast %199 : vector<1x32xf32> to vector<24x32xf32>
    %201 = arith.addf %198, %200 : vector<24x32xf32>
    %202 = arith.mulf %178, %201 : vector<24x32xf32>
    %cst_101 = arith.constant dense<0.000000e+00> : vector<12x32xf32>
    %203 = tpu.matmul %51, %202, %cst_101 {dimension_numbers = #tpu.dot_dimension_numbers<[1], [0], [0], [1], [0, 0, 1, 1], [], []>} : vector<12x24xf32>, vector<24x32xf32>, vector<12x32xf32> -> vector<12x32xf32>
    %c18 = arith.constant 18 : index
    %c0_102 = arith.constant 0 : index
    %204 = vector.load %arg15[%c18, %c0_102] : memref<32x32xf32, #tpu.memory_space<vmem>>, vector<1x32xf32>
    %205 = vector.broadcast %204 : vector<1x32xf32> to vector<12x32xf32>
    %206 = arith.mulf %203, %205 : vector<12x32xf32>
    %207 = arith.addf %138, %206 : vector<12x32xf32>
    %c19 = arith.constant 19 : index
    %c0_103 = arith.constant 0 : index
    %208 = vector.load %arg15[%c19, %c0_103] : memref<32x32xf32, #tpu.memory_space<vmem>>, vector<1x32xf32>
    %209 = vector.broadcast %208 : vector<1x32xf32> to vector<12x32xf32>
    %210 = arith.addf %207, %209 : vector<12x32xf32>
    %cst_104 = arith.constant 0.000000e+00 : f32
    %211 = vector.broadcast %cst_104 : f32 to vector<12x32xf32>
    %212 = arith.maximumf %210, %211 : vector<12x32xf32>
    %cst_105 = arith.constant dense<0.000000e+00> : vector<24x32xf32>
    %213 = tpu.matmul %38, %212, %cst_105 {dimension_numbers = #tpu.dot_dimension_numbers<[1], [0], [0], [1], [0, 0, 1, 1], [], []>} : vector<24x12xf32>, vector<12x32xf32>, vector<24x32xf32> -> vector<24x32xf32>
    %cst_106 = arith.constant dense<0.000000e+00> : vector<24x32xf32>
    %214 = tpu.matmul %44, %212, %cst_106 {dimension_numbers = #tpu.dot_dimension_numbers<[1], [0], [0], [1], [0, 0, 1, 1], [], []>} : vector<24x12xf32>, vector<12x32xf32>, vector<24x32xf32> -> vector<24x32xf32>
    %c2_107 = arith.constant 2 : index
    %c0_108 = arith.constant 0 : index
    %c0_109 = arith.constant 0 : index
    %215 = vector.load %arg8[%c2_107, %c0_108, %c0_109] : memref<3x96x32xf32, #tpu.memory_space<vmem>>, vector<1x96x32xf32>
    %216 = vector.shape_cast %215 : vector<1x96x32xf32> to vector<96x32xf32>
    %c2_110 = arith.constant 2 : index
    %c0_111 = arith.constant 0 : index
    %c0_112 = arith.constant 0 : index
    %217 = vector.load %arg10[%c2_110, %c0_111, %c0_112] : memref<3x96x32xf32, #tpu.memory_space<vmem>>, vector<1x96x32xf32>
    %218 = vector.shape_cast %217 : vector<1x96x32xf32> to vector<96x32xf32>
    %219 = vector.extract_strided_slice %216 {offsets = [0, 0], sizes = [32, 32], strides = [1, 1]} : vector<96x32xf32> to vector<32x32xf32>
    %cst_113 = arith.constant dense<0.000000e+00> : vector<24x32xf32>
    %220 = tpu.matmul %213, %219, %cst_113 {dimension_numbers = #tpu.dot_dimension_numbers<[1], [0], [0], [1], [0, 0, 1, 1], [], []>} : vector<24x32xf32>, vector<32x32xf32>, vector<24x32xf32> -> vector<24x32xf32>
    %221 = vector.extract_strided_slice %216 {offsets = [32, 0], sizes = [32, 32], strides = [1, 1]} : vector<96x32xf32> to vector<32x32xf32>
    %cst_114 = arith.constant dense<0.000000e+00> : vector<24x32xf32>
    %222 = tpu.matmul %214, %221, %cst_114 {dimension_numbers = #tpu.dot_dimension_numbers<[1], [0], [0], [1], [0, 0, 1, 1], [], []>} : vector<24x32xf32>, vector<32x32xf32>, vector<24x32xf32> -> vector<24x32xf32>
    %223 = arith.addf %220, %222 : vector<24x32xf32>
    %224 = vector.extract_strided_slice %216 {offsets = [64, 0], sizes = [32, 32], strides = [1, 1]} : vector<96x32xf32> to vector<32x32xf32>
    %cst_115 = arith.constant dense<0.000000e+00> : vector<24x32xf32>
    %225 = tpu.matmul %25, %224, %cst_115 {dimension_numbers = #tpu.dot_dimension_numbers<[1], [0], [0], [1], [0, 0, 1, 1], [], []>} : vector<24x32xf32>, vector<32x32xf32>, vector<24x32xf32> -> vector<24x32xf32>
    %226 = arith.addf %223, %225 : vector<24x32xf32>
    %c20 = arith.constant 20 : index
    %c0_116 = arith.constant 0 : index
    %227 = vector.load %arg15[%c20, %c0_116] : memref<32x32xf32, #tpu.memory_space<vmem>>, vector<1x32xf32>
    %228 = vector.broadcast %227 : vector<1x32xf32> to vector<24x32xf32>
    %229 = arith.addf %226, %228 : vector<24x32xf32>
    %230 = arith.negf %229 : vector<24x32xf32>
    %231 = math.exp %230 : vector<24x32xf32>
    %cst_117 = arith.constant 1.000000e+00 : f32
    %232 = vector.broadcast %cst_117 : f32 to vector<24x32xf32>
    %233 = arith.addf %232, %231 : vector<24x32xf32>
    %234 = arith.divf %232, %233 : vector<24x32xf32>
    %235 = arith.mulf %229, %234 : vector<24x32xf32>
    %c2_118 = arith.constant 2 : index
    %c0_119 = arith.constant 0 : index
    %c0_120 = arith.constant 0 : index
    %236 = vector.load %arg9[%c2_118, %c0_119, %c0_120] : memref<3x32x32xf32, #tpu.memory_space<vmem>>, vector<1x32x32xf32>
    %237 = vector.shape_cast %236 : vector<1x32x32xf32> to vector<32x32xf32>
    %cst_121 = arith.constant dense<0.000000e+00> : vector<24x32xf32>
    %238 = tpu.matmul %235, %237, %cst_121 {dimension_numbers = #tpu.dot_dimension_numbers<[1], [0], [0], [1], [0, 0, 1, 1], [], []>} : vector<24x32xf32>, vector<32x32xf32>, vector<24x32xf32> -> vector<24x32xf32>
    %c22 = arith.constant 22 : index
    %c0_122 = arith.constant 0 : index
    %239 = vector.load %arg15[%c22, %c0_122] : memref<32x32xf32, #tpu.memory_space<vmem>>, vector<1x32xf32>
    %240 = vector.broadcast %239 : vector<1x32xf32> to vector<24x32xf32>
    %241 = arith.addf %238, %240 : vector<24x32xf32>
    %c24 = arith.constant 24 : index
    %c0_123 = arith.constant 0 : index
    %242 = vector.load %arg15[%c24, %c0_123] : memref<32x32xf32, #tpu.memory_space<vmem>>, vector<1x32xf32>
    %243 = vector.broadcast %242 : vector<1x32xf32> to vector<24x32xf32>
    %244 = arith.mulf %241, %243 : vector<24x32xf32>
    %c25 = arith.constant 25 : index
    %c0_124 = arith.constant 0 : index
    %245 = vector.load %arg15[%c25, %c0_124] : memref<32x32xf32, #tpu.memory_space<vmem>>, vector<1x32xf32>
    %246 = vector.broadcast %245 : vector<1x32xf32> to vector<24x32xf32>
    %247 = arith.addf %244, %246 : vector<24x32xf32>
    %248 = arith.negf %247 : vector<24x32xf32>
    %249 = math.exp %248 : vector<24x32xf32>
    %cst_125 = arith.constant 1.000000e+00 : f32
    %250 = vector.broadcast %cst_125 : f32 to vector<24x32xf32>
    %251 = arith.addf %250, %249 : vector<24x32xf32>
    %252 = arith.divf %250, %251 : vector<24x32xf32>
    %253 = vector.extract_strided_slice %218 {offsets = [0, 0], sizes = [32, 32], strides = [1, 1]} : vector<96x32xf32> to vector<32x32xf32>
    %cst_126 = arith.constant dense<0.000000e+00> : vector<24x32xf32>
    %254 = tpu.matmul %213, %253, %cst_126 {dimension_numbers = #tpu.dot_dimension_numbers<[1], [0], [0], [1], [0, 0, 1, 1], [], []>} : vector<24x32xf32>, vector<32x32xf32>, vector<24x32xf32> -> vector<24x32xf32>
    %255 = vector.extract_strided_slice %218 {offsets = [32, 0], sizes = [32, 32], strides = [1, 1]} : vector<96x32xf32> to vector<32x32xf32>
    %cst_127 = arith.constant dense<0.000000e+00> : vector<24x32xf32>
    %256 = tpu.matmul %214, %255, %cst_127 {dimension_numbers = #tpu.dot_dimension_numbers<[1], [0], [0], [1], [0, 0, 1, 1], [], []>} : vector<24x32xf32>, vector<32x32xf32>, vector<24x32xf32> -> vector<24x32xf32>
    %257 = arith.addf %254, %256 : vector<24x32xf32>
    %258 = vector.extract_strided_slice %218 {offsets = [64, 0], sizes = [32, 32], strides = [1, 1]} : vector<96x32xf32> to vector<32x32xf32>
    %cst_128 = arith.constant dense<0.000000e+00> : vector<24x32xf32>
    %259 = tpu.matmul %25, %258, %cst_128 {dimension_numbers = #tpu.dot_dimension_numbers<[1], [0], [0], [1], [0, 0, 1, 1], [], []>} : vector<24x32xf32>, vector<32x32xf32>, vector<24x32xf32> -> vector<24x32xf32>
    %260 = arith.addf %257, %259 : vector<24x32xf32>
    %c21 = arith.constant 21 : index
    %c0_129 = arith.constant 0 : index
    %261 = vector.load %arg15[%c21, %c0_129] : memref<32x32xf32, #tpu.memory_space<vmem>>, vector<1x32xf32>
    %262 = vector.broadcast %261 : vector<1x32xf32> to vector<24x32xf32>
    %263 = arith.addf %260, %262 : vector<24x32xf32>
    %264 = arith.negf %263 : vector<24x32xf32>
    %265 = math.exp %264 : vector<24x32xf32>
    %cst_130 = arith.constant 1.000000e+00 : f32
    %266 = vector.broadcast %cst_130 : f32 to vector<24x32xf32>
    %267 = arith.addf %266, %265 : vector<24x32xf32>
    %268 = arith.divf %266, %267 : vector<24x32xf32>
    %269 = arith.mulf %263, %268 : vector<24x32xf32>
    %c2_131 = arith.constant 2 : index
    %c0_132 = arith.constant 0 : index
    %c0_133 = arith.constant 0 : index
    %270 = vector.load %arg11[%c2_131, %c0_132, %c0_133] : memref<3x32x32xf32, #tpu.memory_space<vmem>>, vector<1x32x32xf32>
    %271 = vector.shape_cast %270 : vector<1x32x32xf32> to vector<32x32xf32>
    %cst_134 = arith.constant dense<0.000000e+00> : vector<24x32xf32>
    %272 = tpu.matmul %269, %271, %cst_134 {dimension_numbers = #tpu.dot_dimension_numbers<[1], [0], [0], [1], [0, 0, 1, 1], [], []>} : vector<24x32xf32>, vector<32x32xf32>, vector<24x32xf32> -> vector<24x32xf32>
    %c23 = arith.constant 23 : index
    %c0_135 = arith.constant 0 : index
    %273 = vector.load %arg15[%c23, %c0_135] : memref<32x32xf32, #tpu.memory_space<vmem>>, vector<1x32xf32>
    %274 = vector.broadcast %273 : vector<1x32xf32> to vector<24x32xf32>
    %275 = arith.addf %272, %274 : vector<24x32xf32>
    %276 = arith.mulf %252, %275 : vector<24x32xf32>
    %cst_136 = arith.constant dense<0.000000e+00> : vector<12x32xf32>
    %277 = tpu.matmul %51, %276, %cst_136 {dimension_numbers = #tpu.dot_dimension_numbers<[1], [0], [0], [1], [0, 0, 1, 1], [], []>} : vector<12x24xf32>, vector<24x32xf32>, vector<12x32xf32> -> vector<12x32xf32>
    %c26 = arith.constant 26 : index
    %c0_137 = arith.constant 0 : index
    %278 = vector.load %arg15[%c26, %c0_137] : memref<32x32xf32, #tpu.memory_space<vmem>>, vector<1x32xf32>
    %279 = vector.broadcast %278 : vector<1x32xf32> to vector<12x32xf32>
    %280 = arith.mulf %277, %279 : vector<12x32xf32>
    %281 = arith.addf %212, %280 : vector<12x32xf32>
    %c27 = arith.constant 27 : index
    %c0_138 = arith.constant 0 : index
    %282 = vector.load %arg15[%c27, %c0_138] : memref<32x32xf32, #tpu.memory_space<vmem>>, vector<1x32xf32>
    %283 = vector.broadcast %282 : vector<1x32xf32> to vector<12x32xf32>
    %284 = arith.addf %281, %283 : vector<12x32xf32>
    %cst_139 = arith.constant 0.000000e+00 : f32
    %285 = vector.broadcast %cst_139 : f32 to vector<12x32xf32>
    %286 = arith.maximumf %284, %285 : vector<12x32xf32>
    %cst_140 = arith.constant dense<0.000000e+00> : vector<2x32xf32>
    %287 = tpu.matmul %64, %286, %cst_140 {dimension_numbers = #tpu.dot_dimension_numbers<[1], [0], [0], [1], [0, 0, 1, 1], [], []>} : vector<2x12xf32>, vector<12x32xf32>, vector<2x32xf32> -> vector<2x32xf32>
    %c0_141 = arith.constant 0 : index
    %c0_142 = arith.constant 0 : index
    %288 = vector.load %arg12[%c0_141, %c0_142] : memref<32x32xf32, #tpu.memory_space<vmem>>, vector<32x32xf32>
    %cst_143 = arith.constant dense<0.000000e+00> : vector<2x32xf32>
    %289 = tpu.matmul %287, %288, %cst_143 {dimension_numbers = #tpu.dot_dimension_numbers<[1], [0], [0], [1], [0, 0, 1, 1], [], []>} : vector<2x32xf32>, vector<32x32xf32>, vector<2x32xf32> -> vector<2x32xf32>
    %c3 = arith.constant 3 : index
    %c0_144 = arith.constant 0 : index
    %290 = vector.load %arg15[%c3, %c0_144] : memref<32x32xf32, #tpu.memory_space<vmem>>, vector<1x32xf32>
    %291 = vector.broadcast %290 : vector<1x32xf32> to vector<2x32xf32>
    %292 = arith.addf %289, %291 : vector<2x32xf32>
    %cst_145 = arith.constant 0.000000e+00 : f32
    %293 = vector.broadcast %cst_145 : f32 to vector<2x32xf32>
    %294 = arith.maximumf %292, %293 : vector<2x32xf32>
    %295 = math.absf %292 : vector<2x32xf32>
    %cst_146 = arith.constant 0.000000e+00 : f32
    %296 = vector.broadcast %cst_146 : f32 to vector<2x32xf32>
    %297 = arith.subf %296, %295 : vector<2x32xf32>
    %298 = math.exp %297 : vector<2x32xf32>
    %cst_147 = arith.constant 1.000000e+00 : f32
    %299 = vector.broadcast %cst_147 : f32 to vector<2x32xf32>
    %300 = arith.addf %299, %298 : vector<2x32xf32>
    %301 = math.log %300 : vector<2x32xf32>
    %302 = arith.addf %294, %301 : vector<2x32xf32>
    %cst_148 = arith.constant 0.693147182 : f32
    %303 = vector.broadcast %cst_148 : f32 to vector<2x32xf32>
    %304 = arith.subf %302, %303 : vector<2x32xf32>
    %c0_149 = arith.constant 0 : index
    %c0_150 = arith.constant 0 : index
    %305 = vector.load %arg13[%c0_149, %c0_150] : memref<32x1xf32, #tpu.memory_space<vmem>>, vector<32x1xf32>
    %cst_151 = arith.constant dense<0.000000e+00> : vector<2x1xf32>
    %306 = tpu.matmul %304, %305, %cst_151 {dimension_numbers = #tpu.dot_dimension_numbers<[1], [0], [0], [1], [0, 0, 1, 1], [], []>} : vector<2x32xf32>, vector<32x1xf32>, vector<2x1xf32> -> vector<2x1xf32>
    %c0_152 = arith.constant 0 : index
    %c0_153 = arith.constant 0 : index
    %307 = vector.load %arg14[%c0_152, %c0_153] : memref<1x1xf32, #tpu.memory_space<vmem>>, vector<1x1xf32>
    %308 = vector.broadcast %307 : vector<1x1xf32> to vector<2x1xf32>
    %309 = arith.addf %306, %308 : vector<2x1xf32>
    %c0_154 = arith.constant 0 : index
    %c0_155 = arith.constant 0 : index
    %310 = vector.load %arg16[%c0_154, %c0_155] : memref<2x1xf32, #tpu.memory_space<vmem>>, vector<2x1xf32>
    tpu.vector_store %arg16[%c0_154, %c0_155], %309 {strides = array<i32>} : memref<2x1xf32, #tpu.memory_space<vmem>>, vector<2x1xf32>,
    return
  }
}

</mosaic_0001>

<bundles_post_ra>
// kernel: tpu_custom_call.1
= control target key start
LH: loop header
LB: loop body
LE: loop exit
PB: predicated region body
PF: predicated region fallthrough
CT: control target
= control target key end

     0   :  { %vm234_vm0 = vcmask 130048   ;;  %v5298_v3 = vmov 0   ;;  %v5299_v24 = vmov 0.0|0.0   ;;  %vm5300_vm1 = vmmov 0   ;;  %s6413_s6 = inlined_call_operand.vmem [shape: f32[16,32], index: 6, kind: input, shape index: {}]   ;;  %s6414_s0 = inlined_call_operand.vmem [shape: f32[12,16], index: 0, kind: input, shape index: {}]   ;;  %s6415_s1 = inlined_call_operand.vmem [shape: f32[24,1], index: 1, kind: input, shape index: {}]   ;;  %s6416_s2 = inlined_call_operand.vmem [shape: s32[24,1], index: 2, kind: input, shape index: {}]   ;;  %s6417_s3 = inlined_call_operand.vmem [shape: s32[24,1], index: 3, kind: input, shape index: {}]   ;;  %s6418_s7 = inlined_call_operand.vmem [shape: f32[32,32], index: 7, kind: input, shape index: {}]   ;;  %s6419_s15 = inlined_call_operand.vmem [shape: f32[32,32], index: 15, kind: input, shape index: {}]   ;;  %s6420_s8 = inlined_call_operand.vmem [shape: f32[3,96,32], index: 8, kind: input, shape index: {}]   ;;  %s6421_s10 = inlined_call_operand.vmem [shape: f32[3,96,32], index: 10, kind: input, shape index: {}]   ;;  %s6422_s9 = inlined_call_operand.vmem [shape: f32[3,32,32], index: 9, kind: input, shape index: {}]   ;;  %s6423_s11 = inlined_call_operand.vmem [shape: f32[3,32,32], index: 11, kind: input, shape index: {}]   ;;  %s6424_s4 = inlined_call_operand.vmem [shape: s32[1,24], index: 4, kind: input, shape index: {}]   ;;  %s6425_s5 = inlined_call_operand.vmem [shape: s32[1,12], index: 5, kind: input, shape index: {}]   ;;  %s6426_s12 = inlined_call_operand.vmem [shape: f32[32,32], index: 12, kind: input, shape index: {}]   ;;  %s6427_s13 = inlined_call_operand.vmem [shape: f32[32,1], index: 13, kind: input, shape index: {}]   ;;  %s6428_s14 = inlined_call_operand.<no memory space> [shape: f32[1,1], index: 14, kind: input, shape index: {}]   ;;  %s6429_s16 = inlined_call_operand.vmem [shape: f32[2,1], index: 16, kind: output, shape index: {}]  }
   0x1   :  { %6431 = sst [smem:[#allocation3_spill]] %s6413_s6  ;;  %v225_v2 = vld [vmem:[%s6414_s0] sm:$0xff]  ;;  %5158 = vset.pattern.permute.xlu0 %v5298_v3  ;;  %5159 = vset.pattern.permute.xlu1 %v5298_v3  ;;  %v56_v6 = vld [vmem:[%s6415_s1 + $0x8] sm:$0xff]  ;;  %v57_v9 = vld [vmem:[%s6415_s1 + $0x10] sm:$0xff]  ;;  %v5301_v28 = vmov 0.0   ;;  %vm114_vm2 = vcmask 261120   ;;  %v316_v55 = vlaneseq }
   0x2   :  { %s6432_s23 = sld [smem:[#allocation3_spill]]  ;;  %4402 = vmatprep.mubr.msk.f32.mxu1 %vm234_vm0, %v225_v2  ;;  %v55_v5 = vld [vmem:[%s6415_s1] sm:$0xff]  ;;  %v59_v8 = vmax.f32 %v56_v6, 1e-12  ;;  %v60_v10 = vmax.f32 %v57_v9, 1e-12  ;;  %4947 = vmatprep.subr.bf16.mxu0 %v5299_v24 }
   0x3   :  { %v58_v7 = vmax.f32 %v55_v5, 1e-12  ;;  %v226_v11 = vld [vmem:[%s6414_s0 + $0x8] sm:$0xf]  ;;  %v336_v18 = vld [vmem:[%s6416_s2] sm:$0xff]  ;;  %v338_v20 = vld [vmem:[%s6416_s2 + $0x10] sm:$0xff]  ;;  %4389 = vmatprep.mubr.msk.f32.mxu0 %vm5300_vm1, %v5301_v28 }
   0x4   :  { %v337_v19 = vld [vmem:[%s6416_s2 + $0x8] sm:$0xff]  ;;  %v318_v21 = vld [vmem:[%s6417_s3] sm:$0xff]  ;;  %v320_v23 = vld [vmem:[%s6417_s3 + $0x10] sm:$0xff]  ;;  %vm390_vm3 = vcmask 1043456   ;;  %v317_v60 = vand.u32 127, %v316_v55  ;;  %vm5302_vm4 = vmmov 1  }
   0x5   :  { %5160 = vrcp.f32 %v58_v7  ;;  %v319_v22 = vld [vmem:[%s6417_s3 + $0x8] sm:$0xff]  ;;  %v105_v25 = vld [vmem:[%s6418_s7] sm:$0xff]  ;;  %v107_v27 = vld [vmem:[%s6418_s7 + $0x10] sm:$0xff]  ;;  %vm380_vm8 = vcmask 97280   ;;  %vm1391_vm14 = vcmask 195584  }
   0x6   :  { %5162 = vrcp.f32 %v59_v8  ;;  %v106_v26 = vld [vmem:[%s6418_s7 + $0x8] sm:$0xff]  ;;  %v108_v30 = vld [vmem:[%s6418_s7 + $0x18] sm:$0xff]  ;;  %v3907_v32 = vld [vmem:[%s6419_s15 + $0x2] ss:$0 sm:$0xff] }
   0x7   :  { %5164 = vrcp.f32 %v60_v10  ;;  %v4948_v29 = vpack.c.bf16 %v106_v26, %v105_v25  ;;  %v4951_v31 = vpack.c.bf16 %v108_v30, %v107_v27  ;;  %v3915_v57 = vld [vmem:[%s6419_s15] ss:$0 sm:$0xff]  ;;  %vm5469_vm5 = vmpackc.low %vm390_vm3, %vm5302_vm4 }
   0x8   :  { %v227_v0 = vld [vmem:[%s6432_s23] sm:$0xff]  ;;  %v228_v1 = vld [vmem:[%s6432_s23 + $0x8] sm:$0xff] }
   0x9   :  { %v4953_v4 = vpack.c.bf16 %v228_v1, %v227_v0  ;;  %4949 = vmatpush3.bf16.msra.mxu0 %v4948_v29  ;;  %v3818_v0 = vld [vmem:[%s6427_s13 + $0x8] sm:$0xff] }
   0xa   :  { %4950 = vmatprep.subr.bf16.mxu0 %v5299_v24 }
   0xb   :  { %4954 = vmatprep.subr.bf16.mxu1 %v4953_v4 }
   0xc   :  { %4956 = vmatpush3.bf16.msra.mxu1 %v4953_v4 }
   0xd   :  { %4957 = vmatprep.subr.bf16.mxu1 %v5299_v24  ;;  %4952 = vmatpush3.bf16.msra.mxu0 %v4951_v31  ;;  %v3908_v31 = vld [vmem:[%s6419_s15 + $0x1] ss:$0 sm:$0xff] }
   0xe   :  { %4961 = vmatprep.subr.bf16.mxu0 %v5299_v24 }
   0xf   :  { %4403 = vmatmul.mubr.msk.f32.vlgmr.msra.gmra.mrb[0].mxu1 %vm234_vm0, %v226_v11  ;;  %v5161_v12 = vpop.eup %5160  ;;  %v567_v11 = vld [vmem:[%s6420_s8 + $0x20] sm:$0xff]  ;;  %vm373_vm0 = vcmask 91136  }
  0x10   :  { %v5163_v13 = vpop.eup %5162  ;;  %v62_v14 = vmul.f32 -0.75, %v5161_v12  ;;  %4409 = vmatprep.mubr.msk.f32.mxu1 %vm5300_vm1, %v5301_v28  ;;  %v568_v12 = vld [vmem:[%s6420_s8 + $0x28] sm:$0xff] }
  0x11   :  { %v5165_v15 = vpop.eup %5164  ;;  %v64_v16 = vmul.f32 -0.75, %v5163_v13  ;;  %v563_v13 = vld [vmem:[%s6420_s8] sm:$0xff] }
  0x12   :  { %70 = vperm.xlu0 %5158, %v62_v14   ;;  %v66_v17 = vmul.f32 -0.75, %v5165_v15  ;;  %v4966_v14 = vpack.c.bf16 %v568_v12, %v567_v11  ;;  %v564_v15 = vld [vmem:[%s6420_s8 + $0x8] sm:$0xff] }
  0x14   :  { %80 = vperm.xlu1 %5159, %v66_v17   ;;  %v570_v17 = vld [vmem:[%s6420_s8 + $0x38] sm:$0xff] }
  0x16   :  { %75 = vperm.xlu0 %5158, %v64_v16   ;;  %v569_v16 = vld [vmem:[%s6420_s8 + $0x30] sm:$0xff] }
  0x18   :  { %340 = vperm.xlu1 %5159, %v336_v18   ;;  %v4972_v18 = vpack.c.bf16 %v564_v15, %v563_v13  ;;  %v581_v13 = vld [vmem:[%s6421_s10 + $0x30] sm:$0xff] }
  0x1a   :  { %343 = vperm.xlu0 %5158, %v337_v19   ;;  %v565_v19 = vld [vmem:[%s6420_s8 + $0x10] sm:$0xff] }
  0x1c   :  { %346 = vperm.xlu1 %5159, %v338_v20   ;;  %v566_v20 = vld [vmem:[%s6420_s8 + $0x18] sm:$0xff] }
  0x1e   :  { %322 = vperm.xlu0 %5158, %v318_v21   ;;  %v4969_v21 = vpack.c.bf16 %v570_v17, %v569_v16 }
  0x20   :  { %325 = vperm.xlu1 %5159, %v319_v22   ;;  %v4975_v22 = vpack.c.bf16 %v566_v20, %v565_v19  ;;  %v583_v20 = vld [vmem:[%s6421_s10 + $0x40] sm:$0xff] }
  0x22   :  { %328 = vperm.xlu0 %5158, %v320_v23  }
  0x91   :  { %v71_v33 = vpop.permute.xlu0 %70 }
  0x92   :  { %v87_v34 = vsub.f32 %v71_v33, %v3907_v32 }
  0x93   :  { %v81_v35 = vpop.permute.xlu1 %80 }
  0x94   :  { %v90_v36 = vmul.f32 3.875, %v87_v34  ;;  %v89_v37 = vsub.f32 %v81_v35, %v3907_v32 }
  0x95   :  { %v76_v38 = vpop.permute.xlu0 %75 }
  0x96   :  { %v93_v39 = vmul.f32 %v90_v36, %v90_v36  ;;  %v88_v40 = vsub.f32 %v76_v38, %v3907_v32  ;;  %v92_v41 = vmul.f32 3.875, %v89_v37 }
  0x97   :  { %v341_v54 = vpop.permute.xlu1 %340 }
  0x98   :  { %v96_v42 = vsub.f32 0.0, %v93_v39  ;;  %v91_v43 = vmul.f32 3.875, %v88_v40  ;;  %v95_v44 = vmul.f32 %v92_v41, %v92_v41  ;;  %vm348_vm7 = vcmp.eq.s32.totalorder %v317_v60, %v341_v54  ;;  %v571_v41 = vld [vmem:[%s6420_s8 + $0x40] sm:$0xff] }
  0x99   :  { %v344_v56 = vpop.permute.xlu0 %343  ;;  %v5485_v5 = vsel %vm348_vm7, 1.0, %v5301_v28 }
  0x9a   :  { %v99_v45 = vmul.f32 1.442695, %v96_v42  ;;  %v94_v46 = vmul.f32 %v91_v43, %v91_v43  ;;  %v98_v47 = vsub.f32 0.0, %v95_v44  ;;  %vm349_vm9 = vcmp.eq.s32.totalorder %v317_v60, %v344_v56  ;;  %v572_v42 = vld [vmem:[%s6420_s8 + $0x48] sm:$0xff] }
  0x9b   :  { %v347_v58 = vpop.permute.xlu1 %346  ;;  %v5496_v7 = vsel %vm349_vm9, 1.0, %v5301_v28 }
  0x9c   :  { %5166 = vpow2.f32 %v99_v45  ;;  %v97_v48 = vsub.f32 0.0, %v94_v46  ;;  %v103_v50 = vmul.f32 1.442695, %v98_v47  ;;  %vm350_vm12 = vcmp.eq.s32.totalorder %v317_v60, %v347_v58 }
  0x9d   :  { %v323_v1 = vpop.permute.xlu0 %322  ;;  %v5513_v10 = vsel %vm350_vm12, 1.0, %v5301_v28  ;;  %v4978_v45 = vpack.c.bf16 %v572_v42, %v571_v41 }
  0x9e   :  { %v101_v49 = vmul.f32 1.442695, %v97_v48  ;;  %vm330_vm6 = vcmp.eq.s32.totalorder %v317_v60, %v323_v1  ;;  %v573_v48 = vld [vmem:[%s6420_s8 + $0x50] sm:$0xff] }
  0x9f   :  { %v326_v3 = vpop.permute.xlu1 %325  ;;  %v5482_v4 = vsel %vm330_vm6, 1.0, %v5301_v28 }
  0xa0   :  { %5168 = vpow2.f32 %v101_v49  ;;  %vm331_vm10 = vcmp.eq.s32.totalorder %v317_v60, %v326_v3  ;;  %v574_v49 = vld [vmem:[%s6420_s8 + $0x58] sm:$0xff] }
  0xa1   :  { %5170 = vpow2.f32 %v103_v50  ;;  %v329_v6 = vpop.permute.xlu0 %328  ;;  %v5499_v8 = vsel %vm331_vm10, 1.0, %v5301_v28 }
  0xa2   :  { %vm332_vm11 = vcmp.eq.s32.totalorder %v317_v60, %v329_v6  ;;  %v580_v60 = vld [vmem:[%s6421_s10 + $0x28] sm:$0xff] }
  0xa3   :  { %v5510_v9 = vsel %vm332_vm11, 1.0, %v5301_v28 }
  0xa6   :  { %v5167_v51 = vpop.eup %5166 }
  0xa7   :  { %4390 = vmatmul.mubr.msk.f32.vlgmr.msra.gmra.mrb[0].mxu0 %vm114_vm2, %v5167_v51 }
  0xa8   :  { %4392 = vmatprep.mubr.msk.f32.mxu0 %vm5300_vm1, %v5301_v28 }
  0xaa   :  { %v5169_v52 = vpop.eup %5168 }
  0xab   :  { %4393 = vmatmul.mubr.msk.f32.gmra.mrb[2].mxu0 %vm114_vm2, %v5169_v52  ;;  %v5171_v53 = vpop.eup %5170 }
  0xac   :  { %4395 = vmatprep.mubr.msk.f32.mxu0 %vm5300_vm1, %v5301_v28 }
  0xaf   :  { %4396 = vmatmul.mubr.msk.f32.gmra.mrb[4].mxu0 %vm114_vm2, %v5171_v53  ;;  %v4981_v53 = vpack.c.bf16 %v574_v49, %v573_v48 }
  0xb0   :  { %4422 = vmatprep.mubr.msk.f32.mxu0 %vm5300_vm1, %v5301_v28 }
  0xe2   :  { %v4404_v59 = vpop.f32.mrb[0].mxu1 }
  0xe3   :  { %v5465_v61 = vadd.f32 %v4404_v59, %v3915_v57  ;;  %v307_v62 = vpop.f32.mrb[1].mxu1  ;;  %v579_v59 = vld [vmem:[%s6421_s10 + $0x20] sm:$0xff] }
  0xe4   :  { %v5467_v63 = vadd.f32 %v3915_v57, %v307_v62  ;;  %v4990_v11 = vpack.c.bf16 %v580_v60, %v579_v59 }
  0xe6   :  { %v4958_v2 = vpack.c.bf16 %v5465_v61, %v5467_v63 }
  0xe8   :  { %4960 = vmatpush3.bf16.msk.msra.mxu1 %vm5469_vm5, %v4958_v2  ;;  %4964 = vmatpush3.bf16.msk.msra.mxu0 %vm5469_vm5, %v4958_v2 }
  0xe9   :  { %4965 = vmatprep.subr.bf16.mxu1 %v5299_v24  ;;  %4971 = vmatprep.subr.bf16.mxu0 %v5299_v24 }
  0xeb   :  { %4410 = vmatmul.mubr.msk.f32.vlgmr.msra.gmra.mrb[2].mxu1 %vm380_vm8, %v5482_v4  ;;  %4423 = vmatmul.mubr.msk.f32.vlgmr.msra.gmra.mrb[6].mxu0 %vm380_vm8, %v5485_v5 }
  0xec   :  { %4412 = vmatprep.mubr.msk.f32.mxu1 %vm5300_vm1, %v5301_v28  ;;  %4425 = vmatprep.mubr.msk.f32.mxu0 %vm5300_vm1, %v5301_v28 }
  0xed   :  { %4967 = vmatpush3.bf16.msra.mxu1 %v4966_v14  ;;  %4973 = vmatpush3.bf16.msra.mxu0 %v4972_v18  ;;  %v582_v14 = vld [vmem:[%s6421_s10 + $0x38] sm:$0xff] }
  0xee   :  { %4968 = vmatprep.subr.bf16.mxu1 %v5299_v24  ;;  %4974 = vmatprep.subr.bf16.mxu0 %v5299_v24  ;;  %v4993_v16 = vpack.c.bf16 %v582_v14, %v581_v13 }
  0xef   :  { %4413 = vmatmul.mubr.msk.f32.gmra.mrb[4].mxu1 %vm380_vm8, %v5499_v8  ;;  %4426 = vmatmul.mubr.msk.f32.gmra.mrb[8].mxu0 %vm380_vm8, %v5496_v7 }
  0xf0   :  { %4415 = vmatprep.mubr.msk.f32.mxu1 %vm5300_vm1, %v5301_v28  ;;  %4428 = vmatprep.mubr.msk.f32.mxu0 %vm5300_vm1, %v5301_v28 }
  0xf1   :  { %4970 = vmatpush3.bf16.msra.mxu1 %v4969_v21  ;;  %4976 = vmatpush3.bf16.msra.mxu0 %v4975_v22  ;;  %v584_v21 = vld [vmem:[%s6421_s10 + $0x48] sm:$0xff] }
  0xf2   :  { %4977 = vmatprep.subr.bf16.mxu1 %v5299_v24  ;;  %4983 = vmatprep.subr.bf16.mxu0 %v5299_v24  ;;  %v5002_v22 = vpack.c.bf16 %v584_v21, %v583_v20 }
  0xf3   :  { %4416 = vmatmul.mubr.msk.f32.gmra.mrb[6].mxu1 %vm380_vm8, %v5510_v9  ;;  %4429 = vmatmul.mubr.msk.f32.gmra.mrb[10].mxu0 %vm380_vm8, %v5513_v10 }
  0xf4   :  { %4439 = vmatprep.mubr.msk.f32.mxu1 %vm5300_vm1, %v5301_v28  ;;  %4456 = vmatprep.mubr.msk.f32.mxu0 %vm5300_vm1, %v5301_v28 }
 0x17a   :  { %v190_v23 = vpop.f32.mrb[0].mxu0 }
 0x17b   :  { %v4391_v25 = vpop.f32.mrb[1].mxu0  ;;  %v191_v32 = vadd.f32 %v3908_v31, %v190_v23  ;;  %v585_v23 = vld [vmem:[%s6421_s10 + $0x50] sm:$0xff] }
 0x17c   :  { %v586_v25 = vld [vmem:[%s6421_s10 + $0x58] sm:$0xff] }
 0x17d   :  { %v3912_v33 = vmul.f32 -1.442695, %v191_v32 }
 0x17e   :  { %v195_v26 = vpop.f32.mrb[2].mxu0 }
 0x17f   :  { %v4394_v27 = vpop.f32.mrb[3].mxu0  ;;  %v5554_v34 = vadd.f32 %v3908_v31, %v195_v26  ;;  %5172 = vpow2.f32 %v3912_v33  ;;  %v5005_v26 = vpack.c.bf16 %v586_v25, %v585_v23 }
 0x180   :  { %v886_v27 = vld [vmem:[%s6422_s9] sm:$0xff] }
 0x181   :  { %v3913_v35 = vmul.f32 -1.442695, %v5554_v34 }
 0x182   :  { %v200_v29 = vpop.f32.mrb[4].mxu0 }
 0x183   :  { %v4397_v30 = vpop.f32.mrb[5].mxu0  ;;  %v5557_v36 = vadd.f32 %v3908_v31, %v200_v29  ;;  %5174 = vpow2.f32 %v3913_v35  ;;  %v887_v29 = vld [vmem:[%s6422_s9 + $0x8] sm:$0xff]  ;;  %v888_v31 = vld [vmem:[%s6422_s9 + $0x10] sm:$0xff] }
 0x184   :  { %v4984_v30 = vpack.c.bf16 %v887_v29, %v886_v27 }
 0x185   :  { %v3914_v37 = vmul.f32 -1.442695, %v5557_v36 }
 0x187   :  { %5176 = vpow2.f32 %v3914_v37 }
 0x189   :  { %v5173_v38 = vpop.eup %5172 }
 0x18a   :  { %v213_v39 = vadd.f32 1.0, %v5173_v38 }
 0x18c   :  { %5178 = vrcp.f32 %v213_v39 }
 0x18d   :  { %v5175_v40 = vpop.eup %5174 }
 0x18e   :  { %v214_v43 = vadd.f32 1.0, %v5175_v40 }
 0x190   :  { %5180 = vrcp.f32 %v214_v43 }
 0x191   :  { %v5177_v44 = vpop.eup %5176 }
 0x192   :  { %v215_v52 = vadd.f32 1.0, %v5177_v44 }
 0x194   :  { %5182 = vrcp.f32 %v215_v52 }
 0x196   :  { %v5179_v62 = vpop.eup %5178 }
 0x197   :  { %v5607_v12 = vmul.f32 %v5179_v62, %v191_v32  ;;  %v889_v32 = vld [vmem:[%s6422_s9 + $0x18] sm:$0xff] }
 0x198   :  { %v4987_v33 = vpack.c.bf16 %v889_v32, %v888_v31 }
 0x19a   :  { %v5181_v15 = vpop.eup %5180 }
 0x19b   :  { %v5620_v17 = vmul.f32 %v5181_v15, %v5554_v34 }
 0x19e   :  { %v5183_v18 = vpop.eup %5182 }
 0x19f   :  { %v5628_v19 = vmul.f32 %v5183_v18, %v5557_v36 }
 0x1be   :  { %v5566_v46 = vpop.f32.mrb[2].mxu1  ;;  %v549_v47 = vpop.f32.mrb[6].mxu0 }
 0x1bf   :  { %v4411_v50 = vpop.f32.mrb[3].mxu1  ;;  %v4424_v51 = vpop.f32.mrb[7].mxu0  ;;  %4440 = vmatmul.mubr.msk.f32.vlgmr.msra.gmra.mrb[8].mxu1 %vm114_vm2, %v549_v47  ;;  %4457 = vmatmul.mubr.msk.f32.vlgmr.msra.gmra.mrb[12].mxu0 %vm114_vm2, %v5566_v46 }
 0x1c0   :  { %4442 = vmatprep.mubr.msk.f32.mxu1 %vm5300_vm1, %v5301_v28  ;;  %4459 = vmatprep.mubr.msk.f32.mxu0 %vm5300_vm1, %v5301_v28  ;;  %v3937_v51 = vld [vmem:[%s6419_s15 + $0x4] ss:$0 sm:$0xff] }
 0x1c1   :  { %4979 = vmatpush3.bf16.msra.mxu1 %v4978_v45  ;;  %4985 = vmatpush3.bf16.msra.mxu0 %v4984_v30 }
 0x1c2   :  { %v5581_v54 = vpop.f32.mrb[4].mxu1  ;;  %v554_v56 = vpop.f32.mrb[8].mxu0  ;;  %4980 = vmatprep.subr.bf16.mxu1 %v5299_v24  ;;  %4986 = vmatprep.subr.bf16.mxu0 %v5299_v24 }
 0x1c3   :  { %v4414_v57 = vpop.f32.mrb[5].mxu1  ;;  %v4427_v58 = vpop.f32.mrb[9].mxu0  ;;  %4443 = vmatmul.mubr.msk.f32.gmra.mrb[10].mxu1 %vm114_vm2, %v554_v56  ;;  %4460 = vmatmul.mubr.msk.f32.gmra.mrb[14].mxu0 %vm114_vm2, %v5581_v54 }
 0x1c4   :  { %4445 = vmatprep.mubr.msk.f32.mxu1 %vm5300_vm1, %v5301_v28  ;;  %4462 = vmatprep.mubr.msk.f32.mxu0 %vm5300_vm1, %v5301_v28 }
 0x1c5   :  { %4982 = vmatpush3.bf16.msra.mxu1 %v4981_v53  ;;  %4988 = vmatpush3.bf16.msra.mxu0 %v4987_v33  ;;  %v575_v33 = vld [vmem:[%s6421_s10] sm:$0xff] }
 0x1c6   :  { %v5597_v1 = vpop.f32.mrb[6].mxu1  ;;  %v559_v2 = vpop.f32.mrb[10].mxu0  ;;  %4989 = vmatprep.subr.bf16.mxu1 %v5299_v24  ;;  %4995 = vmatprep.subr.bf16.mxu0 %v5299_v24 }
 0x1c7   :  { %v4417_v3 = vpop.f32.mrb[7].mxu1  ;;  %v4430_v6 = vpop.f32.mrb[11].mxu0  ;;  %4446 = vmatmul.mubr.msk.f32.gmra.mrb[12].mxu1 %vm114_vm2, %v559_v2  ;;  %4463 = vmatmul.mubr.msk.f32.gmra.mrb[16].mxu0 %vm114_vm2, %v5597_v1 }
 0x1c8   :  { %4473 = vmatprep.mubr.msk.f32.mxu1 %vm5300_vm1, %v5301_v28  ;;  %4490 = vmatprep.mubr.msk.f32.mxu0 %vm5300_vm1, %v5301_v28 }
 0x1cb   :  { %4474 = vmatmul.mubr.msk.f32.vlgmr.msra.gmra.mrb[14].mxu1 %vm114_vm2, %v5607_v12 }
 0x1cc   :  { %4476 = vmatprep.mubr.msk.f32.mxu1 %vm5300_vm1, %v5301_v28  ;;  %4991 = vmatpush3.bf16.msra.mxu1 %v4990_v11 }
 0x1cd   :  { %4992 = vmatprep.subr.bf16.mxu1 %v5299_v24 }
 0x1cf   :  { %4477 = vmatmul.mubr.msk.f32.gmra.mrb[16].mxu1 %vm114_vm2, %v5620_v17 }
 0x1d0   :  { %4479 = vmatprep.mubr.msk.f32.mxu1 %vm5300_vm1, %v5301_v28  ;;  %4994 = vmatpush3.bf16.msra.mxu1 %v4993_v16 }
 0x1d1   :  { %5001 = vmatprep.subr.bf16.mxu1 %v5299_v24 }
 0x1d3   :  { %4480 = vmatmul.mubr.msk.f32.gmra.mrb[18].mxu1 %vm114_vm2, %v5628_v19 }
 0x1d4   :  { %4507 = vmatprep.mubr.msk.f32.mxu1 %vm5300_vm1, %v5301_v28 }
 0x1d7   :  { %4508 = vmatmul.mubr.msk.f32.vlgmr.msra.gmra.mrb[20].mxu1 %vm114_vm2, %v549_v47 }
 0x1d8   :  { %4510 = vmatprep.mubr.msk.f32.mxu1 %vm5300_vm1, %v5301_v28  ;;  %5003 = vmatpush3.bf16.msra.mxu1 %v5002_v22 }
 0x1d9   :  { %5004 = vmatprep.subr.bf16.mxu1 %v5299_v24 }
 0x1db   :  { %4511 = vmatmul.mubr.msk.f32.gmra.mrb[22].mxu1 %vm114_vm2, %v554_v56 }
 0x1dc   :  { %4513 = vmatprep.mubr.msk.f32.mxu1 %vm5300_vm1, %v5301_v28  ;;  %5006 = vmatpush3.bf16.msra.mxu1 %v5005_v26 }
 0x1df   :  { %4514 = vmatmul.mubr.msk.f32.gmra.mrb[24].mxu1 %vm114_vm2, %v559_v2 }
 0x1e0   :  { %4541 = vmatprep.mubr.msk.f32.mxu1 %vm5300_vm1, %v5301_v28 }
 0x1e3   :  { %4542 = vmatmul.mubr.msk.f32.vlgmr.msra.gmra.mrb[26].mxu1 %vm114_vm2, %v5607_v12 }
 0x1e4   :  { %4544 = vmatprep.mubr.msk.f32.mxu1 %vm5300_vm1, %v5301_v28 }
 0x1e7   :  { %4545 = vmatmul.mubr.msk.f32.gmra.mrb[28].mxu1 %vm114_vm2, %v5620_v17 }
 0x1e8   :  { %4547 = vmatprep.mubr.msk.f32.mxu1 %vm5300_vm1, %v5301_v28 }
 0x1eb   :  { %4548 = vmatmul.mubr.msk.f32.gmra.mrb[30].mxu1 %vm114_vm2, %v5628_v19 }
 0x292   :  { %v662_v34 = vpop.f32.mrb[8].mxu1  ;;  %v751_v35 = vpop.f32.mrb[12].mxu0 }
 0x293   :  { %v752_v36 = vadd.f32 %v751_v35, %v662_v34  ;;  %v4441_v37 = vpop.f32.mrb[9].mxu1  ;;  %v4458_v38 = vpop.f32.mrb[13].mxu0  ;;  %v576_v34 = vld [vmem:[%s6421_s10 + $0x8] sm:$0xff] }
 0x294   :  { %v4996_v38 = vpack.c.bf16 %v576_v34, %v575_v33 }
 0x296   :  { %v667_v39 = vpop.f32.mrb[10].mxu1  ;;  %v756_v40 = vpop.f32.mrb[14].mxu0 }
 0x297   :  { %v757_v41 = vadd.f32 %v756_v40, %v667_v39  ;;  %v4444_v42 = vpop.f32.mrb[11].mxu1  ;;  %v4461_v43 = vpop.f32.mrb[15].mxu0  ;;  %v577_v40 = vld [vmem:[%s6421_s10 + $0x10] sm:$0xff] }
 0x29a   :  { %v672_v44 = vpop.f32.mrb[12].mxu1  ;;  %v761_v45 = vpop.f32.mrb[16].mxu0 }
 0x29b   :  { %v762_v47 = vadd.f32 %v761_v45, %v672_v44  ;;  %v4447_v48 = vpop.f32.mrb[13].mxu1  ;;  %v4464_v49 = vpop.f32.mrb[17].mxu0 }
 0x29e   :  { %v840_v50 = vpop.f32.mrb[14].mxu1 }
 0x29f   :  { %v854_v52 = vadd.f32 %v840_v50, %v752_v36  ;;  %v4475_v53 = vpop.f32.mrb[15].mxu1  ;;  %v1290_v50 = vld [vmem:[%s6423_s11] sm:$0xff] }
 0x2a1   :  { %v862_v56 = vadd.f32 %v3937_v51, %v854_v52 }
 0x2a2   :  { %v845_v57 = vpop.f32.mrb[16].mxu1 }
 0x2a3   :  { %v3938_v58 = vmul.f32 -1.442695, %v862_v56  ;;  %v855_v59 = vadd.f32 %v845_v57, %v757_v41  ;;  %v4478_v60 = vpop.f32.mrb[17].mxu1  ;;  %v578_v41 = vld [vmem:[%s6421_s10 + $0x18] sm:$0xff] }
 0x2a4   :  { %v4999_v45 = vpack.c.bf16 %v578_v41, %v577_v40 }
 0x2a5   :  { %5184 = vpow2.f32 %v3938_v58  ;;  %v863_v62 = vadd.f32 %v3937_v51, %v855_v59 }
 0x2a6   :  { %v850_v2 = vpop.f32.mrb[18].mxu1 }
 0x2a7   :  { %v3939_v3 = vmul.f32 -1.442695, %v863_v62  ;;  %v856_v6 = vadd.f32 %v850_v2, %v762_v47  ;;  %v4481_v11 = vpop.f32.mrb[19].mxu1 }
 0x2a9   :  { %5186 = vpow2.f32 %v3939_v3  ;;  %v864_v13 = vadd.f32 %v3937_v51, %v856_v6  ;;  %v3959_v6 = vld [vmem:[%s6419_s15 + $0x5] ss:$0 sm:$0xff] }
 0x2aa   :  { %v5684_v14 = vpop.f32.mrb[20].mxu1 }
 0x2ab   :  { %v3940_v15 = vmul.f32 -1.442695, %v864_v13  ;;  %v4509_v16 = vpop.f32.mrb[21].mxu1 }
 0x2ad   :  { %5188 = vpow2.f32 %v3940_v15 }
 0x2ae   :  { %v5686_v18 = vpop.f32.mrb[22].mxu1 }
 0x2af   :  { %v5185_v20 = vpop.eup %5184  ;;  %v4512_v21 = vpop.f32.mrb[23].mxu1 }
 0x2b0   :  { %v874_v22 = vadd.f32 1.0, %v5185_v20 }
 0x2b2   :  { %5190 = vrcp.f32 %v874_v22  ;;  %v5688_v23 = vpop.f32.mrb[24].mxu1 }
 0x2b3   :  { %v5187_v25 = vpop.eup %5186  ;;  %v4515_v26 = vpop.f32.mrb[25].mxu1 }
 0x2b4   :  { %v875_v27 = vadd.f32 1.0, %v5187_v25 }
 0x2b6   :  { %5192 = vrcp.f32 %v875_v27  ;;  %v1244_v29 = vpop.f32.mrb[26].mxu1 }
 0x2b7   :  { %v5189_v30 = vpop.eup %5188  ;;  %v4543_v31 = vpop.f32.mrb[27].mxu1 }
 0x2b8   :  { %v876_v32 = vadd.f32 1.0, %v5189_v30 }
 0x2ba   :  { %5194 = vrcp.f32 %v876_v32  ;;  %v1249_v35 = vpop.f32.mrb[28].mxu1 }
 0x2bb   :  { %v4546_v36 = vpop.f32.mrb[29].mxu1 }
 0x2bc   :  { %v5191_v37 = vpop.eup %5190 }
 0x2bd   :  { %v883_v39 = vmul.f32 %v5191_v37, %v862_v56 }
 0x2be   :  { %v1254_v42 = vpop.f32.mrb[30].mxu1 }
 0x2bf   :  { %4491 = vmatmul.mubr.msk.f32.vlgmr.msra.gmra.mrb[18].mxu0 %vm114_vm2, %v883_v39  ;;  %v4549_v43 = vpop.f32.mrb[31].mxu1 }
 0x2c0   :  { %v5193_v44 = vpop.eup %5192  ;;  %4493 = vmatprep.mubr.msk.f32.mxu0 %vm5300_vm1, %v5301_v28  ;;  %4997 = vmatpush3.bf16.msra.mxu0 %v4996_v38  ;;  %v5755_v43 = vshrl.u32 %v316_v55, 7  ;;  %v3945_v55 = vld [vmem:[%s6419_s15 + $0x8] ss:$0 sm:$0xff] }
 0x2c1   :  { %v884_v47 = vmul.f32 %v5193_v44, %v863_v62  ;;  %4998 = vmatprep.subr.bf16.mxu0 %v5299_v24  ;;  %v3918_v44 = vld [vmem:[%s6424_s4] ss:$0 sm:$0xff] }
 0x2c2   :  { %vm362_vm13 = vcmp.eq.s32.totalorder %v5755_v43, %v3918_v44 }
 0x2c3   :  { %4494 = vmatmul.mubr.msk.f32.gmra.mrb[20].mxu0 %vm114_vm2, %v884_v47  ;;  %v3941_v47 = vld [vmem:[%s6419_s15 + $0x6] ss:$0 sm:$0xff] }
 0x2c4   :  { %v5195_v48 = vpop.eup %5194  ;;  %4496 = vmatprep.mubr.msk.f32.mxu0 %vm5300_vm1, %v5301_v28  ;;  %5000 = vmatpush3.bf16.msra.mxu0 %v4999_v45  ;;  %v5762_v45 = vsel %vm362_vm13, 1.0, %v5301_v28 }
 0x2c5   :  { %v885_v49 = vmul.f32 %v5195_v48, %v864_v13  ;;  %5007 = vmatprep.subr.bf16.mxu0 %v5299_v24  ;;  %4573 = vmatprep.mubr.msk.f32.mxu1 %vm1391_vm14, %v5762_v45 }
 0x2c7   :  { %4497 = vmatmul.mubr.msk.f32.gmra.mrb[22].mxu0 %vm114_vm2, %v885_v49 }
 0x2c8   :  { %4524 = vmatprep.mubr.msk.f32.mxu0 %vm5300_vm1, %v5301_v28 }
 0x2cb   :  { %4525 = vmatmul.mubr.msk.f32.vlgmr.msra.gmra.mrb[24].mxu0 %vm114_vm2, %v5566_v46  ;;  %v1291_v46 = vld [vmem:[%s6423_s11 + $0x8] sm:$0xff] }
 0x2cc   :  { %4527 = vmatprep.mubr.msk.f32.mxu0 %vm5300_vm1, %v5301_v28  ;;  %v5008_v51 = vpack.c.bf16 %v1291_v46, %v1290_v50  ;;  %v3946_v46 = vld [vmem:[%s6419_s15 + $0x9] ss:$0 sm:$0xff] }
 0x2ce   :  { %5009 = vmatpush3.bf16.msra.mxu0 %v5008_v51 }
 0x2cf   :  { %4528 = vmatmul.mubr.msk.f32.gmra.mrb[26].mxu0 %vm114_vm2, %v5581_v54  ;;  %5010 = vmatprep.subr.bf16.mxu0 %v5299_v24  ;;  %v1292_v54 = vld [vmem:[%s6423_s11 + $0x10] sm:$0xff] }
 0x2d0   :  { %4530 = vmatprep.mubr.msk.f32.mxu0 %vm5300_vm1, %v5301_v28 }
 0x2d3   :  { %4531 = vmatmul.mubr.msk.f32.gmra.mrb[28].mxu0 %vm114_vm2, %v5597_v1  ;;  %v1293_v1 = vld [vmem:[%s6423_s11 + $0x18] sm:$0xff] }
 0x2d4   :  { %4558 = vmatprep.mubr.msk.f32.mxu0 %vm5300_vm1, %v5301_v28  ;;  %v5011_v52 = vpack.c.bf16 %v1293_v1, %v1292_v54 }
 0x2d6   :  { %5012 = vmatpush3.bf16.msra.mxu0 %v5011_v52 }
 0x2d7   :  { %5021 = vmatprep.subr.bf16.mxu0 %v5299_v24 }
 0x392   :  { %v970_v53 = vpop.f32.mrb[18].mxu0 }
 0x393   :  { %v4492_v56 = vpop.f32.mrb[19].mxu0  ;;  %v971_v48 = vadd.f32 %v3941_v47, %v970_v53 }
 0x395   :  { %v989_v49 = vmul.f32 %v3945_v55, %v971_v48 }
 0x396   :  { %v975_v57 = vpop.f32.mrb[20].mxu0 }
 0x397   :  { %v4495_v58 = vpop.f32.mrb[21].mxu0  ;;  %v976_v50 = vadd.f32 %v3941_v47, %v975_v57  ;;  %v997_v51 = vadd.f32 %v3946_v46, %v989_v49 }
 0x399   :  { %v990_v54 = vmul.f32 %v3945_v55, %v976_v50  ;;  %v3947_v52 = vmul.f32 -1.442695, %v997_v51  ;;  %v3983_v50 = vld [vmem:[%s6420_s8 + $0x80] sm:$0xff]  ;;  %v3980_v51 = vld [vmem:[%s6420_s8 + $0x68] sm:$0xff] }
 0x39a   :  { %v980_v59 = vpop.f32.mrb[22].mxu0 }
 0x39b   :  { %v4498_v60 = vpop.f32.mrb[23].mxu0  ;;  %v981_v1 = vadd.f32 %v3941_v47, %v980_v59  ;;  %v998_v56 = vadd.f32 %v3946_v46, %v990_v54  ;;  %v3963_v59 = vld [vmem:[%s6419_s15 + $0x7] ss:$0 sm:$0xff] }
 0x39d   :  { %v991_v58 = vmul.f32 %v3945_v55, %v981_v1  ;;  %v3948_v60 = vmul.f32 -1.442695, %v998_v56  ;;  %v3986_v56 = vld [vmem:[%s6420_s8 + $0x98] sm:$0xff] }
 0x39e   :  { %v1164_v62 = vpop.f32.mrb[24].mxu0 }
 0x39f   :  { %v1165_v2 = vadd.f32 %v1164_v62, %v5684_v14  ;;  %v4526_v3 = vpop.f32.mrb[25].mxu0  ;;  %v999_v62 = vadd.f32 %v3946_v46, %v991_v58  ;;  %v3981_v58 = vld [vmem:[%s6420_s8 + $0x70] sm:$0xff] }
 0x3a1   :  { %v1258_v11 = vadd.f32 %v1244_v29, %v1165_v2  ;;  %v3949_v53 = vmul.f32 -1.442695, %v999_v62 }
 0x3a2   :  { %v1169_v13 = vpop.f32.mrb[26].mxu0 }
 0x3a3   :  { %v1266_v15 = vadd.f32 %v3959_v6, %v1258_v11  ;;  %v1170_v16 = vadd.f32 %v1169_v13, %v5686_v18  ;;  %v4529_v20 = vpop.f32.mrb[27].mxu0 }
 0x3a5   :  { %v3960_v21 = vmul.f32 -1.442695, %v1266_v15  ;;  %v1259_v22 = vadd.f32 %v1249_v35, %v1170_v16 }
 0x3a6   :  { %v1174_v25 = vpop.f32.mrb[28].mxu0 }
 0x3a7   :  { %5196 = vpow2.f32 %v3960_v21  ;;  %v1267_v26 = vadd.f32 %v3959_v6, %v1259_v22  ;;  %v1175_v27 = vadd.f32 %v1174_v25, %v5688_v23  ;;  %v4532_v30 = vpop.f32.mrb[29].mxu0 }
 0x3a9   :  { %v3961_v14 = vmul.f32 -1.442695, %v1267_v26  ;;  %v1260_v31 = vadd.f32 %v1254_v42, %v1175_v27 }
 0x3ab   :  { %5198 = vpow2.f32 %v3961_v14  ;;  %v1268_v32 = vadd.f32 %v3959_v6, %v1260_v31  ;;  %v356_v31 = vadd.s32 8, %v5755_v43 }
 0x3ad   :  { %v3962_v33 = vmul.f32 -1.442695, %v1268_v32  ;;  %vm363_vm15 = vcmp.eq.s32.totalorder %v356_v31, %v3918_v44 }
 0x3af   :  { %5200 = vpow2.f32 %v3962_v33 }
 0x3b1   :  { %v5197_v29 = vpop.eup %5196 }
 0x3b2   :  { %v1278_v34 = vadd.f32 1.0, %v5197_v29 }
 0x3b4   :  { %5202 = vrcp.f32 %v1278_v34 }
 0x3b5   :  { %v5199_v36 = vpop.eup %5198 }
 0x3b6   :  { %v1279_v18 = vadd.f32 1.0, %v5199_v36 }
 0x3b8   :  { %5204 = vrcp.f32 %v1279_v18 }
 0x3b9   :  { %v5201_v37 = vpop.eup %5200 }
 0x3ba   :  { %v1280_v35 = vadd.f32 1.0, %v5201_v37  ;;  %v5780_v37 = vsel %vm363_vm15, 1.0, %v5301_v28 }
 0x3bc   :  { %5206 = vrcp.f32 %v1280_v35  ;;  %v3969_v35 = vld [vmem:[%s6419_s15 + $0xa] ss:$0 sm:$0xff] }
 0x3bd   :  { %5208 = vpow2.f32 %v3947_v52  ;;  %v3985_v52 = vld [vmem:[%s6420_s8 + $0x90] sm:$0xff] }
 0x3be   :  { %v5203_v38 = vpop.eup %5202  ;;  %5210 = vpow2.f32 %v3948_v60  ;;  %v3982_v60 = vld [vmem:[%s6420_s8 + $0x78] sm:$0xff]  ;;  %v5029_v62 = vpack.c.bf16 %v3986_v56, %v3985_v52 }
 0x3bf   :  { %v1287_v39 = vmul.f32 %v5203_v38, %v1266_v15  ;;  %5212 = vpow2.f32 %v3949_v53  ;;  %v5035_v53 = vpack.c.bf16 %v3982_v60, %v3981_v58 }
 0x3c1   :  { %4559 = vmatmul.mubr.msk.f32.vlgmr.msra.gmra.mrb[30].mxu0 %vm114_vm2, %v1287_v39 }
 0x3c2   :  { %v5205_v23 = vpop.eup %5204  ;;  %4561 = vmatprep.mubr.msk.f32.mxu0 %vm5300_vm1, %v5301_v28 }
 0x3c3   :  { %v1288_v40 = vmul.f32 %v5205_v23, %v1267_v26 }
 0x3c5   :  { %4562 = vmatmul.mubr.msk.f32.gmra.mrb[32].mxu0 %vm114_vm2, %v1288_v40  ;;  %v3970_v40 = vld [vmem:[%s6419_s15 + $0xb] ss:$0 sm:$0xff] }
 0x3c6   :  { %v5207_v41 = vpop.eup %5206  ;;  %4564 = vmatprep.mubr.msk.f32.mxu0 %vm5300_vm1, %v5301_v28 }
 0x3c7   :  { %v1289_v42 = vmul.f32 %v5207_v41, %v1268_v32  ;;  %v5209_v2 = vpop.eup %5208 }
 0x3c8   :  { %v1009_v3 = vadd.f32 1.0, %v5209_v2  ;;  %v5211_v6 = vpop.eup %5210  ;;  %v3987_v2 = vld [vmem:[%s6420_s8 + $0xa0] sm:$0xff] }
 0x3c9   :  { %4565 = vmatmul.mubr.msk.f32.gmra.mrb[34].mxu0 %vm114_vm2, %v1289_v42  ;;  %v1010_v57 = vadd.f32 1.0, %v5211_v6  ;;  %v5213_v11 = vpop.eup %5212 }
 0x3ca   :  { %4593 = vmatprep.mubr.msk.f32.mxu0 %vm5300_vm1, %v5301_v28  ;;  %5214 = vrcp.f32 %v1009_v3  ;;  %v1011_v13 = vadd.f32 1.0, %v5213_v11  ;;  %v3988_v3 = vld [vmem:[%s6420_s8 + $0xa8] sm:$0xff] }
 0x3cb   :  { %5216 = vrcp.f32 %v1010_v57  ;;  %v5038_v6 = vpack.c.bf16 %v3988_v3, %v3987_v2 }
 0x3cc   :  { %5218 = vrcp.f32 %v1011_v13  ;;  %v3989_v13 = vld [vmem:[%s6420_s8 + $0xb0] sm:$0xff] }
 0x3d4   :  { %v5215_v21 = vpop.eup %5214 }
 0x3d5   :  { %v5217_v30 = vpop.eup %5216 }
 0x3d6   :  { %v5219_v36 = vpop.eup %5218 }
 0x494   :  { %v1374_v15 = vpop.f32.mrb[30].mxu0 }
 0x495   :  { %v1375_v16 = vadd.f32 %v3963_v59, %v1374_v15  ;;  %v4560_v20 = vpop.f32.mrb[31].mxu0 }
 0x497   :  { %v1388_v22 = vmul.f32 %v5215_v21, %v1375_v16 }
 0x498   :  { %v1379_v25 = vpop.f32.mrb[32].mxu0 }
 0x499   :  { %v1380_v26 = vadd.f32 %v3963_v59, %v1379_v25  ;;  %v4563_v27 = vpop.f32.mrb[33].mxu0 }
 0x49a   :  { %v3995_v27 = vld [vmem:[%s6421_s10 + $0x80] sm:$0xff] }
 0x49b   :  { %v1389_v14 = vmul.f32 %v5217_v30, %v1380_v26  ;;  %v3996_v30 = vld [vmem:[%s6421_s10 + $0x88] sm:$0xff] }
 0x49c   :  { %v1384_v32 = vpop.f32.mrb[34].mxu0 }
 0x49d   :  { %v1385_v33 = vadd.f32 %v3963_v59, %v1384_v32  ;;  %v4566_v29 = vpop.f32.mrb[35].mxu0  ;;  %v5013_v34 = vpack.c.bf16 %v1389_v14, %v1388_v22  ;;  %v3990_v59 = vld [vmem:[%s6420_s8 + $0xb8] sm:$0xff] }
 0x49e   :  { %v5041_v20 = vpack.c.bf16 %v3990_v59, %v3989_v13  ;;  %v5050_v29 = vpack.c.bf16 %v3996_v30, %v3995_v27 }
 0x49f   :  { %v1390_v18 = vmul.f32 %v5219_v36, %v1385_v33  ;;  %5014 = vmatprep.subr.bf16.mxu1 %v5013_v34  ;;  %v3998_v36 = vld [vmem:[%s6421_s10 + $0x98] sm:$0xff] }
 0x4a0   :  { %5016 = vmatpush3.bf16.msra.mxu1 %v5013_v34  ;;  %v3997_v34 = vld [vmem:[%s6421_s10 + $0x90] sm:$0xff] }
 0x4a1   :  { %4571 = vmatprep.subr.mxu1 %v1390_v18 }
 0x4a4   :  { %4572 = vmatpush3.msra.mxu1 %v1390_v18  ;;  %v5053_v18 = vpack.c.bf16 %v3998_v36, %v3997_v34 }
 0x4a5   :  { %4574 = vmatmul.mubr.msk.f32.vlgmr.msra.gmra.mrb[32].mxu1 %vm1391_vm14, %v5780_v37  ;;  %5017 = vmatprep.subr.bf16.mxu1 %v5299_v24 }
 0x4a6   :  { %4580 = vmatprep.mubr.msk.f32.mxu1 %vm5300_vm1, %v5301_v28 }
 0x578   :  { %v4575_v38 = vpop.f32.mrb[32].mxu1 }
 0x579   :  { %v1479_v39 = vmul.f32 %v4575_v38, %v3969_v35  ;;  %v1464_v23 = vpop.f32.mrb[33].mxu1  ;;  %v4000_v38 = vld [vmem:[%s6421_s10 + $0xa8] sm:$0xff] }
 0x57a   :  { %v1478_v41 = vmul.f32 %v3969_v35, %v1464_v23  ;;  %v3999_v35 = vld [vmem:[%s6421_s10 + $0xa0] sm:$0xff]  ;;  %v4001_v23 = vld [vmem:[%s6421_s10 + $0xb0] sm:$0xff] }
 0x57b   :  { %v1481_v42 = vadd.f32 %v1479_v39, %v5465_v61  ;;  %v3984_v61 = vld [vmem:[%s6420_s8 + $0x88] sm:$0xff]  ;;  %v5062_v39 = vpack.c.bf16 %v4000_v38, %v3999_v35 }
 0x57c   :  { %v1480_v44 = vadd.f32 %v1478_v41, %v5467_v63  ;;  %v3979_v63 = vld [vmem:[%s6420_s8 + $0x60] sm:$0xff]  ;;  %v5026_v54 = vpack.c.bf16 %v3984_v61, %v3983_v50  ;;  %v4019_v61 = vld [vmem:[%s6422_s9 + $0x38] sm:$0xff] }
 0x57d   :  { %v5795_v47 = vadd.f32 %v3970_v40, %v1481_v42  ;;  %v5032_v1 = vpack.c.bf16 %v3980_v51, %v3979_v63  ;;  %v4016_v42 = vld [vmem:[%s6422_s9 + $0x20] sm:$0xff] }
 0x57e   :  { %v5797_v48 = vadd.f32 %v3970_v40, %v1480_v44  ;;  %v4002_v40 = vld [vmem:[%s6421_s10 + $0xb8] sm:$0xff]  ;;  %v4017_v44 = vld [vmem:[%s6422_s9 + $0x28] sm:$0xff] }
 0x57f   :  { %v1490_v55 = vmax.f32 %v5795_v47, 0.0  ;;  %v5065_v41 = vpack.c.bf16 %v4002_v40, %v4001_v23  ;;  %v5044_v50 = vpack.c.bf16 %v4017_v44, %v4016_v42 }
 0x580   :  { %v1489_v49 = vmax.f32 %v5797_v48, 0.0  ;;  %v4067_v48 = vld [vmem:[%s6420_s8 + $0xe8] sm:$0xff] }
 0x582   :  { %v5018_v46 = vpack.c.bf16 %v1490_v55, %v1489_v49 }
 0x584   :  { %5020 = vmatpush3.bf16.msk.msra.mxu1 %vm5469_vm5, %v5018_v46  ;;  %5024 = vmatpush3.bf16.msk.msra.mxu0 %vm5469_vm5, %v5018_v46  ;;  %v4018_v46 = vld [vmem:[%s6422_s9 + $0x30] sm:$0xff] }
 0x585   :  { %5025 = vmatprep.subr.bf16.mxu1 %v5299_v24  ;;  %5031 = vmatprep.subr.bf16.mxu0 %v5299_v24  ;;  %v5047_v63 = vpack.c.bf16 %v4019_v61, %v4018_v46 }
 0x587   :  { %4581 = vmatmul.mubr.msk.f32.vlgmr.msra.gmra.mrb[34].mxu1 %vm380_vm8, %v5482_v4  ;;  %4594 = vmatmul.mubr.msk.f32.vlgmr.msra.gmra.mrb[36].mxu0 %vm380_vm8, %v5485_v5 }
 0x588   :  { %4583 = vmatprep.mubr.msk.f32.mxu1 %vm5300_vm1, %v5301_v28  ;;  %4596 = vmatprep.mubr.msk.f32.mxu0 %vm5300_vm1, %v5301_v28 }
 0x589   :  { %5027 = vmatpush3.bf16.msra.mxu1 %v5026_v54  ;;  %5033 = vmatpush3.bf16.msra.mxu0 %v5032_v1 }
 0x58a   :  { %5028 = vmatprep.subr.bf16.mxu1 %v5299_v24  ;;  %5034 = vmatprep.subr.bf16.mxu0 %v5299_v24 }
 0x58b   :  { %4584 = vmatmul.mubr.msk.f32.gmra.mrb[36].mxu1 %vm380_vm8, %v5499_v8  ;;  %4597 = vmatmul.mubr.msk.f32.gmra.mrb[38].mxu0 %vm380_vm8, %v5496_v7 }
 0x58c   :  { %4586 = vmatprep.mubr.msk.f32.mxu1 %vm5300_vm1, %v5301_v28  ;;  %4599 = vmatprep.mubr.msk.f32.mxu0 %vm5300_vm1, %v5301_v28 }
 0x58d   :  { %5030 = vmatpush3.bf16.msra.mxu1 %v5029_v62  ;;  %5036 = vmatpush3.bf16.msra.mxu0 %v5035_v53 }
 0x58e   :  { %5037 = vmatprep.subr.bf16.mxu1 %v5299_v24  ;;  %5043 = vmatprep.subr.bf16.mxu0 %v5299_v24 }
 0x58f   :  { %4587 = vmatmul.mubr.msk.f32.gmra.mrb[38].mxu1 %vm380_vm8, %v5510_v9  ;;  %4600 = vmatmul.mubr.msk.f32.gmra.mrb[40].mxu0 %vm380_vm8, %v5513_v10 }
 0x590   :  { %4610 = vmatprep.mubr.msk.f32.mxu1 %vm5300_vm1, %v5301_v28  ;;  %4627 = vmatprep.mubr.msk.f32.mxu0 %vm5300_vm1, %v5301_v28 }
 0x65a   :  { %v5869_v57 = vpop.f32.mrb[34].mxu1  ;;  %v1640_v11 = vpop.f32.mrb[36].mxu0 }
 0x65b   :  { %v4582_v15 = vpop.f32.mrb[35].mxu1  ;;  %v4595_v16 = vpop.f32.mrb[37].mxu0  ;;  %4611 = vmatmul.mubr.msk.f32.vlgmr.msra.gmra.mrb[40].mxu1 %vm114_vm2, %v1640_v11  ;;  %4628 = vmatmul.mubr.msk.f32.vlgmr.msra.gmra.mrb[42].mxu0 %vm114_vm2, %v5869_v57 }
 0x65c   :  { %4613 = vmatprep.mubr.msk.f32.mxu1 %vm5300_vm1, %v5301_v28  ;;  %4630 = vmatprep.mubr.msk.f32.mxu0 %vm5300_vm1, %v5301_v28  ;;  %v4012_v16 = vld [vmem:[%s6419_s15 + $0xc] ss:$0 sm:$0xff] }
 0x65d   :  { %5039 = vmatpush3.bf16.msra.mxu1 %v5038_v6  ;;  %5045 = vmatpush3.bf16.msra.mxu0 %v5044_v50 }
 0x65e   :  { %v5884_v21 = vpop.f32.mrb[36].mxu1  ;;  %v1645_v22 = vpop.f32.mrb[38].mxu0  ;;  %5040 = vmatprep.subr.bf16.mxu1 %v5299_v24  ;;  %5046 = vmatprep.subr.bf16.mxu0 %v5299_v24 }
 0x65f   :  { %v4585_v25 = vpop.f32.mrb[37].mxu1  ;;  %v4598_v26 = vpop.f32.mrb[39].mxu0  ;;  %4614 = vmatmul.mubr.msk.f32.gmra.mrb[42].mxu1 %vm114_vm2, %v1645_v22  ;;  %4631 = vmatmul.mubr.msk.f32.gmra.mrb[44].mxu0 %vm114_vm2, %v5884_v21 }
 0x660   :  { %4616 = vmatprep.mubr.msk.f32.mxu1 %vm5300_vm1, %v5301_v28  ;;  %4633 = vmatprep.mubr.msk.f32.mxu0 %vm5300_vm1, %v5301_v28 }
 0x661   :  { %5042 = vmatpush3.bf16.msra.mxu1 %v5041_v20  ;;  %5048 = vmatpush3.bf16.msra.mxu0 %v5047_v63 }
 0x662   :  { %v5900_v14 = vpop.f32.mrb[38].mxu1  ;;  %v1650_v31 = vpop.f32.mrb[40].mxu0  ;;  %5049 = vmatprep.subr.bf16.mxu1 %v5299_v24  ;;  %5055 = vmatprep.subr.bf16.mxu0 %v5299_v24 }
 0x663   :  { %v4588_v32 = vpop.f32.mrb[39].mxu1  ;;  %v4601_v33 = vpop.f32.mrb[41].mxu0  ;;  %4617 = vmatmul.mubr.msk.f32.gmra.mrb[44].mxu1 %vm114_vm2, %v1650_v31  ;;  %4634 = vmatmul.mubr.msk.f32.gmra.mrb[46].mxu0 %vm114_vm2, %v5900_v14 }
 0x664   :  { %4644 = vmatprep.mubr.msk.f32.mxu1 %vm5300_vm1, %v5301_v28  ;;  %4661 = vmatprep.mubr.msk.f32.mxu0 %vm5300_vm1, %v5301_v28 }
 0x667   :  { %4645 = vmatmul.mubr.msk.f32.vlgmr.msra.gmra.mrb[46].mxu1 %vm114_vm2, %v5607_v12 }
 0x668   :  { %4647 = vmatprep.mubr.msk.f32.mxu1 %vm5300_vm1, %v5301_v28  ;;  %5051 = vmatpush3.bf16.msra.mxu1 %v5050_v29 }
 0x669   :  { %5052 = vmatprep.subr.bf16.mxu1 %v5299_v24 }
 0x66b   :  { %4648 = vmatmul.mubr.msk.f32.gmra.mrb[48].mxu1 %vm114_vm2, %v5620_v17 }
 0x66c   :  { %4650 = vmatprep.mubr.msk.f32.mxu1 %vm5300_vm1, %v5301_v28  ;;  %5054 = vmatpush3.bf16.msra.mxu1 %v5053_v18 }
 0x66d   :  { %5061 = vmatprep.subr.bf16.mxu1 %v5299_v24 }
 0x66f   :  { %4651 = vmatmul.mubr.msk.f32.gmra.mrb[50].mxu1 %vm114_vm2, %v5628_v19 }
 0x670   :  { %4678 = vmatprep.mubr.msk.f32.mxu1 %vm5300_vm1, %v5301_v28 }
 0x673   :  { %4679 = vmatmul.mubr.msk.f32.vlgmr.msra.gmra.mrb[52].mxu1 %vm114_vm2, %v1640_v11 }
 0x674   :  { %4681 = vmatprep.mubr.msk.f32.mxu1 %vm5300_vm1, %v5301_v28  ;;  %5063 = vmatpush3.bf16.msra.mxu1 %v5062_v39 }
 0x675   :  { %5064 = vmatprep.subr.bf16.mxu1 %v5299_v24 }
 0x677   :  { %4682 = vmatmul.mubr.msk.f32.gmra.mrb[54].mxu1 %vm114_vm2, %v1645_v22 }
 0x678   :  { %4684 = vmatprep.mubr.msk.f32.mxu1 %vm5300_vm1, %v5301_v28  ;;  %5066 = vmatpush3.bf16.msra.mxu1 %v5065_v41 }
 0x67b   :  { %4685 = vmatmul.mubr.msk.f32.gmra.mrb[56].mxu1 %vm114_vm2, %v1650_v31 }
 0x67c   :  { %4712 = vmatprep.mubr.msk.f32.mxu1 %vm5300_vm1, %v5301_v28 }
 0x67f   :  { %4713 = vmatmul.mubr.msk.f32.vlgmr.msra.gmra.mrb[58].mxu1 %vm114_vm2, %v5607_v12 }
 0x680   :  { %4715 = vmatprep.mubr.msk.f32.mxu1 %vm5300_vm1, %v5301_v28 }
 0x683   :  { %4716 = vmatmul.mubr.msk.f32.gmra.mrb[60].mxu1 %vm114_vm2, %v5620_v17 }
 0x684   :  { %4718 = vmatprep.mubr.msk.f32.mxu1 %vm5300_vm1, %v5301_v28 }
 0x687   :  { %4719 = vmatmul.mubr.msk.f32.gmra.mrb[62].mxu1 %vm114_vm2, %v5628_v19 }
 0x688   :  { %4744 = vmatprep.mubr.msk.f32.mxu1 %vm1391_vm14, %v5762_v45 }
 0x72e   :  { %v1755_v51 = vpop.f32.mrb[40].mxu1  ;;  %v1844_v54 = vpop.f32.mrb[42].mxu0 }
 0x72f   :  { %v1845_v1 = vadd.f32 %v1844_v54, %v1755_v51  ;;  %v4612_v52 = vpop.f32.mrb[41].mxu1  ;;  %v4629_v56 = vpop.f32.mrb[43].mxu0 }
 0x730   :  { %v3991_v52 = vld [vmem:[%s6421_s10 + $0x60] sm:$0xff]  ;;  %v3992_v56 = vld [vmem:[%s6421_s10 + $0x68] sm:$0xff] }
 0x732   :  { %v1760_v58 = vpop.f32.mrb[42].mxu1  ;;  %v1849_v60 = vpop.f32.mrb[44].mxu0 }
 0x733   :  { %v1850_v62 = vadd.f32 %v1849_v60, %v1760_v58  ;;  %v4615_v53 = vpop.f32.mrb[43].mxu1  ;;  %v4632_v2 = vpop.f32.mrb[45].mxu0 }
 0x734   :  { %v5056_v53 = vpack.c.bf16 %v3992_v56, %v3991_v52 }
 0x736   :  { %v1765_v3 = vpop.f32.mrb[44].mxu1  ;;  %v1854_v6 = vpop.f32.mrb[46].mxu0 }
 0x737   :  { %v1855_v11 = vadd.f32 %v1854_v6, %v1765_v3  ;;  %v4618_v13 = vpop.f32.mrb[45].mxu1  ;;  %v4635_v59 = vpop.f32.mrb[47].mxu0  ;;  %v3993_v3 = vld [vmem:[%s6421_s10 + $0x70] sm:$0xff]  ;;  %v3994_v6 = vld [vmem:[%s6421_s10 + $0x78] sm:$0xff] }
 0x73a   :  { %v1924_v15 = vpop.f32.mrb[46].mxu1 }
 0x73b   :  { %v1938_v20 = vadd.f32 %v1924_v15, %v1845_v1  ;;  %v4646_v22 = vpop.f32.mrb[47].mxu1  ;;  %v5059_v15 = vpack.c.bf16 %v3994_v6, %v3993_v3 }
 0x73d   :  { %v1946_v25 = vadd.f32 %v4012_v16, %v1938_v20 }
 0x73e   :  { %v1929_v26 = vpop.f32.mrb[48].mxu1 }
 0x73f   :  { %v4013_v27 = vmul.f32 -1.442695, %v1946_v25  ;;  %v1939_v30 = vadd.f32 %v1929_v26, %v1850_v62  ;;  %v4649_v31 = vpop.f32.mrb[49].mxu1 }
 0x741   :  { %5220 = vpow2.f32 %v4013_v27  ;;  %v1947_v32 = vadd.f32 %v4012_v16, %v1939_v30 }
 0x742   :  { %v1934_v33 = vpop.f32.mrb[50].mxu1 }
 0x743   :  { %v4014_v29 = vmul.f32 -1.442695, %v1947_v32  ;;  %v1940_v34 = vadd.f32 %v1934_v33, %v1855_v11  ;;  %v4652_v36 = vpop.f32.mrb[51].mxu1 }
 0x745   :  { %5222 = vpow2.f32 %v4014_v29  ;;  %v1948_v18 = vadd.f32 %v4012_v16, %v1940_v34 }
 0x746   :  { %v5981_v35 = vpop.f32.mrb[52].mxu1 }
 0x747   :  { %v4015_v38 = vmul.f32 -1.442695, %v1948_v18  ;;  %v4680_v39 = vpop.f32.mrb[53].mxu1 }
 0x748   :  { %v4038_v39 = vld [vmem:[%s6419_s15 + $0xd] ss:$0 sm:$0xff] }
 0x749   :  { %5224 = vpow2.f32 %v4015_v38 }
 0x74a   :  { %v5983_v23 = vpop.f32.mrb[54].mxu1 }
 0x74b   :  { %v5221_v40 = vpop.eup %5220  ;;  %v4683_v41 = vpop.f32.mrb[55].mxu1 }
 0x74c   :  { %v1958_v42 = vadd.f32 1.0, %v5221_v40 }
 0x74e   :  { %5226 = vrcp.f32 %v1958_v42  ;;  %v5985_v44 = vpop.f32.mrb[56].mxu1 }
 0x74f   :  { %v5223_v50 = vpop.eup %5222  ;;  %v4686_v46 = vpop.f32.mrb[57].mxu1 }
 0x750   :  { %v1959_v61 = vadd.f32 1.0, %v5223_v50 }
 0x752   :  { %5228 = vrcp.f32 %v1959_v61  ;;  %v2329_v63 = vpop.f32.mrb[58].mxu1 }
 0x753   :  { %v5225_v51 = vpop.eup %5224  ;;  %v4714_v54 = vpop.f32.mrb[59].mxu1 }
 0x754   :  { %v1960_v1 = vadd.f32 1.0, %v5225_v51 }
 0x756   :  { %5230 = vrcp.f32 %v1960_v1  ;;  %v2334_v58 = vpop.f32.mrb[60].mxu1 }
 0x757   :  { %v4717_v60 = vpop.f32.mrb[61].mxu1 }
 0x758   :  { %v5227_v62 = vpop.eup %5226 }
 0x759   :  { %v1967_v2 = vmul.f32 %v5227_v62, %v1946_v25  ;;  %v4042_v25 = vld [vmem:[%s6423_s11 + $0x20] sm:$0xff] }
 0x75a   :  { %v2339_v11 = vpop.f32.mrb[62].mxu1 }
 0x75b   :  { %4662 = vmatmul.mubr.msk.f32.vlgmr.msra.gmra.mrb[48].mxu0 %vm114_vm2, %v1967_v2  ;;  %v4720_v13 = vpop.f32.mrb[63].mxu1 }
 0x75c   :  { %v5229_v59 = vpop.eup %5228  ;;  %4664 = vmatprep.mubr.msk.f32.mxu0 %vm5300_vm1, %v5301_v28  ;;  %5057 = vmatpush3.bf16.msra.mxu0 %v5056_v53 }
 0x75d   :  { %v1968_v16 = vmul.f32 %v5229_v59, %v1947_v32  ;;  %5058 = vmatprep.subr.bf16.mxu0 %v5299_v24 }
 0x75f   :  { %4665 = vmatmul.mubr.msk.f32.gmra.mrb[50].mxu0 %vm114_vm2, %v1968_v16 }
 0x760   :  { %v5231_v20 = vpop.eup %5230  ;;  %4667 = vmatprep.mubr.msk.f32.mxu0 %vm5300_vm1, %v5301_v28  ;;  %5060 = vmatpush3.bf16.msra.mxu0 %v5059_v15 }
 0x761   :  { %v1969_v22 = vmul.f32 %v5231_v20, %v1948_v18  ;;  %5067 = vmatprep.subr.bf16.mxu0 %v5299_v24  ;;  %v4020_v20 = vld [vmem:[%s6419_s15 + $0xe] ss:$0 sm:$0xff] }
 0x763   :  { %4668 = vmatmul.mubr.msk.f32.gmra.mrb[52].mxu0 %vm114_vm2, %v1969_v22 }
 0x764   :  { %4695 = vmatprep.mubr.msk.f32.mxu0 %vm5300_vm1, %v5301_v28 }
 0x767   :  { %4696 = vmatmul.mubr.msk.f32.vlgmr.msra.gmra.mrb[54].mxu0 %vm114_vm2, %v5869_v57  ;;  %v4043_v57 = vld [vmem:[%s6423_s11 + $0x28] sm:$0xff] }
 0x768   :  { %4698 = vmatprep.mubr.msk.f32.mxu0 %vm5300_vm1, %v5301_v28  ;;  %v5068_v26 = vpack.c.bf16 %v4043_v57, %v4042_v25  ;;  %v4024_v25 = vld [vmem:[%s6419_s15 + $0x10] ss:$0 sm:$0xff] }
 0x76a   :  { %5069 = vmatpush3.bf16.msra.mxu0 %v5068_v26 }
 0x76b   :  { %4699 = vmatmul.mubr.msk.f32.gmra.mrb[56].mxu0 %vm114_vm2, %v5884_v21  ;;  %5070 = vmatprep.subr.bf16.mxu0 %v5299_v24  ;;  %v4044_v21 = vld [vmem:[%s6423_s11 + $0x30] sm:$0xff] }
 0x76c   :  { %4701 = vmatprep.mubr.msk.f32.mxu0 %vm5300_vm1, %v5301_v28 }
 0x76f   :  { %4702 = vmatmul.mubr.msk.f32.gmra.mrb[58].mxu0 %vm114_vm2, %v5900_v14  ;;  %v4045_v14 = vld [vmem:[%s6423_s11 + $0x38] sm:$0xff] }
 0x770   :  { %4729 = vmatprep.mubr.msk.f32.mxu0 %vm5300_vm1, %v5301_v28  ;;  %v5071_v27 = vpack.c.bf16 %v4045_v14, %v4044_v21  ;;  %v4025_v21 = vld [vmem:[%s6419_s15 + $0x11] ss:$0 sm:$0xff] }
 0x772   :  { %5072 = vmatpush3.bf16.msra.mxu0 %v5071_v27 }
 0x773   :  { %5081 = vmatprep.subr.bf16.mxu0 %v5299_v24 }
 0x82e   :  { %v2055_v30 = vpop.f32.mrb[48].mxu0 }
 0x82f   :  { %v4663_v31 = vpop.f32.mrb[49].mxu0  ;;  %v2056_v22 = vadd.f32 %v4020_v20, %v2055_v30 }
 0x831   :  { %v2074_v57 = vmul.f32 %v4024_v25, %v2056_v22 }
 0x832   :  { %v2060_v32 = vpop.f32.mrb[50].mxu0 }
 0x833   :  { %v4666_v33 = vpop.f32.mrb[51].mxu0  ;;  %v2061_v26 = vadd.f32 %v4020_v20, %v2060_v32  ;;  %v2082_v14 = vadd.f32 %v4025_v21, %v2074_v57 }
 0x835   :  { %v2075_v27 = vmul.f32 %v4024_v25, %v2061_v26  ;;  %v4026_v33 = vmul.f32 -1.442695, %v2082_v14 }
 0x836   :  { %v2065_v29 = vpop.f32.mrb[52].mxu0 }
 0x837   :  { %v4669_v34 = vpop.f32.mrb[53].mxu0  ;;  %v2066_v31 = vadd.f32 %v4020_v20, %v2065_v29  ;;  %v4046_v29 = vld [vmem:[%s6419_s15 + $0xf] ss:$0 sm:$0xff] }
 0x838   :  { %v2083_v34 = vadd.f32 %v4025_v21, %v2075_v27 }
 0x83a   :  { %v2249_v36 = vpop.f32.mrb[54].mxu0 }
 0x83b   :  { %v2250_v18 = vadd.f32 %v2249_v36, %v5981_v35  ;;  %v4697_v38 = vpop.f32.mrb[55].mxu0  ;;  %v2076_v36 = vmul.f32 %v4024_v25, %v2066_v31  ;;  %v4068_v31 = vld [vmem:[%s6420_s8 + $0xf0] sm:$0xff] }
 0x83d   :  { %v2343_v40 = vadd.f32 %v2329_v63, %v2250_v18  ;;  %v4027_v18 = vmul.f32 -1.442695, %v2083_v34  ;;  %v2084_v38 = vadd.f32 %v4025_v21, %v2076_v36  ;;  %v4066_v21 = vld [vmem:[%s6420_s8 + $0xe0] sm:$0xff]  ;;  %v4064_v34 = vld [vmem:[%s6420_s8 + $0xd0] sm:$0xff]  ;;  %v4065_v36 = vld [vmem:[%s6420_s8 + $0xd8] sm:$0xff] }
 0x83e   :  { %v2254_v41 = vpop.f32.mrb[56].mxu0  ;;  %v5086_v14 = vpack.c.bf16 %v4067_v48, %v4066_v21 }
 0x83f   :  { %v2351_v42 = vadd.f32 %v4038_v39, %v2343_v40  ;;  %v2255_v50 = vadd.f32 %v2254_v41, %v5983_v23  ;;  %v4700_v46 = vpop.f32.mrb[57].mxu0  ;;  %v4028_v30 = vmul.f32 -1.442695, %v2084_v38  ;;  %v5095_v38 = vpack.c.bf16 %v4065_v36, %v4064_v34  ;;  %v4095_v36 = vld [vmem:[%s6419_s15 + $0x14] ss:$0 sm:$0xff] }
 0x841   :  { %v4039_v61 = vmul.f32 -1.442695, %v2351_v42  ;;  %v2344_v51 = vadd.f32 %v2334_v58, %v2255_v50 }
 0x842   :  { %v2259_v54 = vpop.f32.mrb[58].mxu0 }
 0x843   :  { %5232 = vpow2.f32 %v4039_v61  ;;  %v2352_v1 = vadd.f32 %v4038_v39, %v2344_v51  ;;  %v2260_v52 = vadd.f32 %v2259_v54, %v5985_v44  ;;  %v4703_v56 = vpop.f32.mrb[59].mxu0 }
 0x845   :  { %v4040_v35 = vmul.f32 -1.442695, %v2352_v1  ;;  %v2345_v60 = vadd.f32 %v2339_v11, %v2260_v52 }
 0x847   :  { %5234 = vpow2.f32 %v4040_v35  ;;  %v2353_v62 = vadd.f32 %v4038_v39, %v2345_v60 }
 0x849   :  { %v4041_v53 = vmul.f32 -1.442695, %v2353_v62 }
 0x84b   :  { %5236 = vpow2.f32 %v4041_v53 }
 0x84d   :  { %v5233_v63 = vpop.eup %5232 }
 0x84e   :  { %v2363_v2 = vadd.f32 1.0, %v5233_v63 }
 0x850   :  { %5238 = vrcp.f32 %v2363_v2 }
 0x851   :  { %v5235_v3 = vpop.eup %5234 }
 0x852   :  { %v2364_v23 = vadd.f32 1.0, %v5235_v3 }
 0x854   :  { %5240 = vrcp.f32 %v2364_v23 }
 0x855   :  { %v5237_v6 = vpop.eup %5236 }
 0x856   :  { %v2365_v58 = vadd.f32 1.0, %v5237_v6 }
 0x858   :  { %5242 = vrcp.f32 %v2365_v58  ;;  %v4052_v58 = vld [vmem:[%s6419_s15 + $0x12] ss:$0 sm:$0xff] }
 0x859   :  { %5244 = vpow2.f32 %v4026_v33  ;;  %v4069_v33 = vld [vmem:[%s6420_s8 + $0xf8] sm:$0xff] }
 0x85a   :  { %v5239_v13 = vpop.eup %5238  ;;  %5246 = vpow2.f32 %v4027_v18  ;;  %v5089_v18 = vpack.c.bf16 %v4069_v33, %v4068_v31 }
 0x85b   :  { %v2372_v59 = vmul.f32 %v5239_v13, %v2351_v42  ;;  %5248 = vpow2.f32 %v4028_v30  ;;  %v4073_v30 = vld [vmem:[%s6420_s8 + $0x118] sm:$0xff] }
 0x85d   :  { %4730 = vmatmul.mubr.msk.f32.vlgmr.msra.gmra.mrb[60].mxu0 %vm114_vm2, %v2372_v59 }
 0x85e   :  { %v5241_v44 = vpop.eup %5240  ;;  %4732 = vmatprep.mubr.msk.f32.mxu0 %vm5300_vm1, %v5301_v28 }
 0x85f   :  { %v2373_v11 = vmul.f32 %v5241_v44, %v2352_v1 }
 0x861   :  { %4733 = vmatmul.mubr.msk.f32.gmra.mrb[62].mxu0 %vm114_vm2, %v2373_v11  ;;  %v4053_v11 = vld [vmem:[%s6419_s15 + $0x13] ss:$0 sm:$0xff] }
 0x862   :  { %v5243_v15 = vpop.eup %5242  ;;  %4735 = vmatprep.mubr.msk.f32.mxu0 %vm5300_vm1, %v5301_v28 }
 0x863   :  { %v2374_v16 = vmul.f32 %v5243_v15, %v2353_v62  ;;  %v5245_v39 = vpop.eup %5244 }
 0x864   :  { %v2094_v40 = vadd.f32 1.0, %v5245_v39  ;;  %v5247_v41 = vpop.eup %5246 }
 0x865   :  { %4736 = vmatmul.mubr.msk.f32.gmra.mrb[64].mxu0 %vm114_vm2, %v2374_v16  ;;  %v2095_v32 = vadd.f32 1.0, %v5247_v41  ;;  %v5249_v42 = vpop.eup %5248 }
 0x866   :  { %4764 = vmatprep.mubr.msk.f32.mxu0 %vm5300_vm1, %v5301_v28  ;;  %5250 = vrcp.f32 %v2094_v40  ;;  %v2096_v50 = vadd.f32 1.0, %v5249_v42 }
 0x867   :  { %5252 = vrcp.f32 %v2095_v32 }
 0x868   :  { %5254 = vrcp.f32 %v2096_v50 }
 0x870   :  { %v5251_v54 = vpop.eup %5250 }
 0x871   :  { %v5253_v60 = vpop.eup %5252 }
 0x872   :  { %v5255_v23 = vpop.eup %5254 }
 0x930   :  { %v2460_v46 = vpop.f32.mrb[60].mxu0 }
 0x931   :  { %v2461_v61 = vadd.f32 %v4046_v29, %v2460_v46  ;;  %v4731_v51 = vpop.f32.mrb[61].mxu0  ;;  %v4078_v46 = vld [vmem:[%s6421_s10 + $0xe0] sm:$0xff] }
 0x933   :  { %v2474_v1 = vmul.f32 %v5251_v54, %v2461_v61  ;;  %v4079_v61 = vld [vmem:[%s6421_s10 + $0xe8] sm:$0xff] }
 0x934   :  { %v2465_v52 = vpop.f32.mrb[62].mxu0 }
 0x935   :  { %v2466_v56 = vadd.f32 %v4046_v29, %v2465_v52  ;;  %v4734_v35 = vpop.f32.mrb[63].mxu0 }
 0x936   :  { %v4080_v35 = vld [vmem:[%s6421_s10 + $0xf0] sm:$0xff] }
 0x937   :  { %v2475_v62 = vmul.f32 %v5253_v60, %v2466_v56  ;;  %v5110_v56 = vpack.c.bf16 %v4079_v61, %v4078_v46  ;;  %v4081_v60 = vld [vmem:[%s6421_s10 + $0xf8] sm:$0xff] }
 0x938   :  { %v2470_v53 = vpop.f32.mrb[64].mxu0 }
 0x939   :  { %v2471_v63 = vadd.f32 %v4046_v29, %v2470_v53  ;;  %v4737_v2 = vpop.f32.mrb[65].mxu0  ;;  %v5073_v3 = vpack.c.bf16 %v2475_v62, %v2474_v1  ;;  %v5113_v62 = vpack.c.bf16 %v4081_v60, %v4080_v35  ;;  %v4082_v53 = vld [vmem:[%s6421_s10 + $0x100] sm:$0xff] }
 0x93b   :  { %v2476_v6 = vmul.f32 %v5255_v23, %v2471_v63  ;;  %5074 = vmatprep.subr.bf16.mxu1 %v5073_v3  ;;  %v4083_v63 = vld [vmem:[%s6421_s10 + $0x108] sm:$0xff]  ;;  %v4085_v23 = vld [vmem:[%s6421_s10 + $0x118] sm:$0xff] }
 0x93c   :  { %5076 = vmatpush3.bf16.msra.mxu1 %v5073_v3  ;;  %v5122_v2 = vpack.c.bf16 %v4083_v63, %v4082_v53  ;;  %v4084_v3 = vld [vmem:[%s6421_s10 + $0x110] sm:$0xff] }
 0x93d   :  { %4742 = vmatprep.subr.mxu1 %v2476_v6 }
 0x940   :  { %4743 = vmatpush3.msra.mxu1 %v2476_v6  ;;  %v5125_v6 = vpack.c.bf16 %v4085_v23, %v4084_v3 }
 0x941   :  { %4745 = vmatmul.mubr.msk.f32.vlgmr.msra.gmra.mrb[64].mxu1 %vm1391_vm14, %v5780_v37  ;;  %5077 = vmatprep.subr.bf16.mxu1 %v5299_v24 }
 0x942   :  { %4751 = vmatprep.mubr.msk.f32.mxu1 %vm5300_vm1, %v5301_v28 }
 0xa14   :  { %v4746_v13 = vpop.f32.mrb[64].mxu1 }
 0xa15   :  { %v2558_v59 = vmul.f32 %v4746_v13, %v4052_v58  ;;  %v2543_v44 = vpop.f32.mrb[65].mxu1 }
 0xa16   :  { %v2557_v15 = vmul.f32 %v4052_v58, %v2543_v44  ;;  %v4099_v58 = vld [vmem:[%s6422_s9 + $0x40] sm:$0xff] }
 0xa17   :  { %v2560_v16 = vadd.f32 %v2558_v59, %v1490_v55  ;;  %v4062_v55 = vld [vmem:[%s6420_s8 + $0xc0] sm:$0xff] }
 0xa18   :  { %v2559_v20 = vadd.f32 %v2557_v15, %v1489_v49  ;;  %v4063_v49 = vld [vmem:[%s6420_s8 + $0xc8] sm:$0xff] }
 0xa19   :  { %v6078_v22 = vadd.f32 %v4053_v11, %v2560_v16  ;;  %v5092_v27 = vpack.c.bf16 %v4063_v49, %v4062_v55 }
 0xa1a   :  { %v6080_v25 = vadd.f32 %v4053_v11, %v2559_v20 }
 0xa1b   :  { %v2569_v57 = vmax.f32 %v6078_v22, 0.0 }
 0xa1c   :  { %v2568_v26 = vmax.f32 %v6080_v25, 0.0 }
 0xa1e   :  { %v5078_v47 = vpack.c.bf16 %v2569_v57, %v2568_v26 }
 0xa20   :  { %5080 = vmatpush3.bf16.msk.msra.mxu1 %vm5469_vm5, %v5078_v47  ;;  %5084 = vmatpush3.bf16.msk.msra.mxu0 %vm5469_vm5, %v5078_v47 }
 0xa21   :  { %5085 = vmatprep.subr.bf16.mxu1 %v5299_v24  ;;  %5091 = vmatprep.subr.bf16.mxu0 %v5299_v24 }
 0xa23   :  { %4752 = vmatmul.mubr.msk.f32.vlgmr.msra.gmra.mrb[66].mxu1 %vm380_vm8, %v5482_v4  ;;  %4765 = vmatmul.mubr.msk.f32.vlgmr.msra.gmra.mrb[66].mxu0 %vm380_vm8, %v5485_v5  ;;  %v4070_v4 = vld [vmem:[%s6420_s8 + $0x100] sm:$0xff]  ;;  %v4071_v5 = vld [vmem:[%s6420_s8 + $0x108] sm:$0xff] }
 0xa24   :  { %4754 = vmatprep.mubr.msk.f32.mxu1 %vm5300_vm1, %v5301_v28  ;;  %4767 = vmatprep.mubr.msk.f32.mxu0 %vm5300_vm1, %v5301_v28 }
 0xa25   :  { %5087 = vmatpush3.bf16.msra.mxu1 %v5086_v14  ;;  %5093 = vmatpush3.bf16.msra.mxu0 %v5092_v27 }
 0xa26   :  { %5088 = vmatprep.subr.bf16.mxu1 %v5299_v24  ;;  %5094 = vmatprep.subr.bf16.mxu0 %v5299_v24 }
 0xa27   :  { %4755 = vmatmul.mubr.msk.f32.gmra.mrb[68].mxu1 %vm380_vm8, %v5499_v8  ;;  %4768 = vmatmul.mubr.msk.f32.gmra.mrb[68].mxu0 %vm380_vm8, %v5496_v7  ;;  %v5098_v7 = vpack.c.bf16 %v4071_v5, %v4070_v4 }
 0xa28   :  { %4757 = vmatprep.mubr.msk.f32.mxu1 %vm5300_vm1, %v5301_v28  ;;  %4770 = vmatprep.mubr.msk.f32.mxu0 %vm5300_vm1, %v5301_v28 }
 0xa29   :  { %5090 = vmatpush3.bf16.msra.mxu1 %v5089_v18  ;;  %5096 = vmatpush3.bf16.msra.mxu0 %v5095_v38 }
 0xa2a   :  { %5097 = vmatprep.subr.bf16.mxu1 %v5299_v24  ;;  %5103 = vmatprep.subr.bf16.mxu0 %v5299_v24 }
 0xa2b   :  { %4758 = vmatmul.mubr.msk.f32.gmra.mrb[70].mxu1 %vm380_vm8, %v5510_v9  ;;  %4771 = vmatmul.mubr.msk.f32.gmra.mrb[70].mxu0 %vm380_vm8, %v5513_v10  ;;  %v4072_v10 = vld [vmem:[%s6420_s8 + $0x110] sm:$0xff] }
 0xa2c   :  { %4781 = vmatprep.mubr.msk.f32.mxu1 %vm5300_vm1, %v5301_v28  ;;  %4798 = vmatprep.mubr.msk.f32.mxu0 %vm5300_vm1, %v5301_v28  ;;  %v5101_v41 = vpack.c.bf16 %v4073_v30, %v4072_v10 }
 0xaf6   :  { %v6152_v8 = vpop.f32.mrb[66].mxu1  ;;  %v2719_v9 = vpop.f32.mrb[66].mxu0 }
 0xaf7   :  { %v4753_v39 = vpop.f32.mrb[67].mxu1  ;;  %v4766_v40 = vpop.f32.mrb[67].mxu0  ;;  %4782 = vmatmul.mubr.msk.f32.vlgmr.msra.gmra.mrb[72].mxu1 %vm114_vm2, %v2719_v9  ;;  %4799 = vmatmul.mubr.msk.f32.vlgmr.msra.gmra.mrb[72].mxu0 %vm114_vm2, %v6152_v8 }
 0xaf8   :  { %4784 = vmatprep.mubr.msk.f32.mxu1 %vm5300_vm1, %v5301_v28  ;;  %4801 = vmatprep.mubr.msk.f32.mxu0 %vm5300_vm1, %v5301_v28 }
 0xaf9   :  { %5099 = vmatpush3.bf16.msra.mxu1 %v5098_v7 }
 0xafa   :  { %v6167_v32 = vpop.f32.mrb[68].mxu1  ;;  %v2724_v42 = vpop.f32.mrb[68].mxu0  ;;  %5100 = vmatprep.subr.bf16.mxu1 %v5299_v24 }
 0xafb   :  { %v4756_v50 = vpop.f32.mrb[69].mxu1  ;;  %v4769_v29 = vpop.f32.mrb[69].mxu0  ;;  %4785 = vmatmul.mubr.msk.f32.gmra.mrb[74].mxu1 %vm114_vm2, %v2724_v42  ;;  %4802 = vmatmul.mubr.msk.f32.gmra.mrb[74].mxu0 %vm114_vm2, %v6167_v32 }
 0xafc   :  { %4787 = vmatprep.mubr.msk.f32.mxu1 %vm5300_vm1, %v5301_v28  ;;  %4804 = vmatprep.mubr.msk.f32.mxu0 %vm5300_vm1, %v5301_v28 }
 0xafd   :  { %5102 = vmatpush3.bf16.msra.mxu1 %v5101_v41 }
 0xafe   :  { %v6183_v51 = vpop.f32.mrb[70].mxu1  ;;  %v2729_v54 = vpop.f32.mrb[70].mxu0  ;;  %5109 = vmatprep.subr.bf16.mxu1 %v5299_v24 }
 0xaff   :  { %v4759_v1 = vpop.f32.mrb[71].mxu1  ;;  %v4772_v52 = vpop.f32.mrb[71].mxu0  ;;  %4788 = vmatmul.mubr.msk.f32.gmra.mrb[76].mxu1 %vm114_vm2, %v2729_v54  ;;  %4805 = vmatmul.mubr.msk.f32.gmra.mrb[76].mxu0 %vm114_vm2, %v6183_v51 }
 0xb00   :  { %4815 = vmatprep.mubr.msk.f32.mxu1 %vm5300_vm1, %v5301_v28  ;;  %4832 = vmatprep.mubr.msk.f32.mxu0 %vm5300_vm1, %v5301_v28 }
 0xb03   :  { %4816 = vmatmul.mubr.msk.f32.vlgmr.msra.gmra.mrb[78].mxu1 %vm114_vm2, %v5607_v12 }
 0xb04   :  { %4818 = vmatprep.mubr.msk.f32.mxu1 %vm5300_vm1, %v5301_v28  ;;  %5111 = vmatpush3.bf16.msra.mxu1 %v5110_v56 }
 0xb05   :  { %5112 = vmatprep.subr.bf16.mxu1 %v5299_v24 }
 0xb07   :  { %4819 = vmatmul.mubr.msk.f32.gmra.mrb[80].mxu1 %vm114_vm2, %v5620_v17 }
 0xb08   :  { %4821 = vmatprep.mubr.msk.f32.mxu1 %vm5300_vm1, %v5301_v28  ;;  %5114 = vmatpush3.bf16.msra.mxu1 %v5113_v62 }
 0xb09   :  { %5121 = vmatprep.subr.bf16.mxu1 %v5299_v24 }
 0xb0b   :  { %4822 = vmatmul.mubr.msk.f32.gmra.mrb[82].mxu1 %vm114_vm2, %v5628_v19 }
 0xb0c   :  { %4849 = vmatprep.mubr.msk.f32.mxu1 %vm5300_vm1, %v5301_v28 }
 0xb0f   :  { %4850 = vmatmul.mubr.msk.f32.vlgmr.msra.gmra.mrb[84].mxu1 %vm114_vm2, %v2719_v9 }
 0xb10   :  { %4852 = vmatprep.mubr.msk.f32.mxu1 %vm5300_vm1, %v5301_v28  ;;  %5123 = vmatpush3.bf16.msra.mxu1 %v5122_v2 }
 0xb11   :  { %5124 = vmatprep.subr.bf16.mxu1 %v5299_v24 }
 0xb13   :  { %4853 = vmatmul.mubr.msk.f32.gmra.mrb[86].mxu1 %vm114_vm2, %v2724_v42 }
 0xb14   :  { %4855 = vmatprep.mubr.msk.f32.mxu1 %vm5300_vm1, %v5301_v28  ;;  %5126 = vmatpush3.bf16.msra.mxu1 %v5125_v6  ;;  %v4074_v6 = vld [vmem:[%s6421_s10 + $0xc0] sm:$0xff] }
 0xb17   :  { %4856 = vmatmul.mubr.msk.f32.gmra.mrb[88].mxu1 %vm114_vm2, %v2729_v54 }
 0xb18   :  { %4883 = vmatprep.mubr.msk.f32.mxu1 %vm5300_vm1, %v5301_v28 }
 0xb1b   :  { %4884 = vmatmul.mubr.msk.f32.vlgmr.msra.gmra.mrb[90].mxu1 %vm114_vm2, %v5607_v12  ;;  %v4100_v12 = vld [vmem:[%s6422_s9 + $0x48] sm:$0xff] }
 0xb1c   :  { %4886 = vmatprep.mubr.msk.f32.mxu1 %vm5300_vm1, %v5301_v28  ;;  %v5104_v13 = vpack.c.bf16 %v4100_v12, %v4099_v58  ;;  %v4075_v58 = vld [vmem:[%s6421_s10 + $0xc8] sm:$0xff] }
 0xb1e   :  { %5105 = vmatpush3.bf16.msra.mxu0 %v5104_v13 }
 0xb1f   :  { %4887 = vmatmul.mubr.msk.f32.gmra.mrb[92].mxu1 %vm114_vm2, %v5620_v17  ;;  %5106 = vmatprep.subr.bf16.mxu0 %v5299_v24  ;;  %v4101_v17 = vld [vmem:[%s6422_s9 + $0x50] sm:$0xff] }
 0xb20   :  { %4889 = vmatprep.mubr.msk.f32.mxu1 %vm5300_vm1, %v5301_v28 }
 0xb23   :  { %4890 = vmatmul.mubr.msk.f32.gmra.mrb[94].mxu1 %vm114_vm2, %v5628_v19  ;;  %v4102_v19 = vld [vmem:[%s6422_s9 + $0x58] sm:$0xff] }
 0xb24   :  { %4915 = vmatprep.mubr.msk.f32.mxu1 %vm1391_vm14, %v5762_v45  ;;  %v5107_v45 = vpack.c.bf16 %v4102_v19, %v4101_v17  ;;  %v5116_v19 = vpack.c.bf16 %v4075_v58, %v4074_v6 }
 0xb26   :  { %5108 = vmatpush3.bf16.msra.mxu0 %v5107_v45 }
 0xb27   :  { %5115 = vmatprep.subr.bf16.mxu0 %v5299_v24 }
 0xbca   :  { %v2834_v59 = vpop.f32.mrb[72].mxu1  ;;  %v2923_v44 = vpop.f32.mrb[72].mxu0 }
 0xbcb   :  { %v2924_v11 = vadd.f32 %v2923_v44, %v2834_v59  ;;  %v4783_v15 = vpop.f32.mrb[73].mxu1  ;;  %v4800_v16 = vpop.f32.mrb[73].mxu0  ;;  %v4076_v59 = vld [vmem:[%s6421_s10 + $0xd0] sm:$0xff]  ;;  %v4077_v44 = vld [vmem:[%s6421_s10 + $0xd8] sm:$0xff] }
 0xbce   :  { %v2839_v20 = vpop.f32.mrb[74].mxu1  ;;  %v2928_v21 = vpop.f32.mrb[74].mxu0 }
 0xbcf   :  { %v2929_v47 = vadd.f32 %v2928_v21, %v2839_v20  ;;  %v4786_v48 = vpop.f32.mrb[75].mxu1  ;;  %v4803_v55 = vpop.f32.mrb[75].mxu0  ;;  %v5119_v20 = vpack.c.bf16 %v4077_v44, %v4076_v59  ;;  %v4103_v59 = vld [vmem:[%s6419_s15 + $0x16] ss:$0 sm:$0xff] }
 0xbd0   :  { %v4125_v55 = vld [vmem:[%s6423_s11 + $0x40] sm:$0xff] }
 0xbd2   :  { %v2844_v49 = vpop.f32.mrb[76].mxu1  ;;  %v2933_v14 = vpop.f32.mrb[76].mxu0 }
 0xbd3   :  { %v2934_v27 = vadd.f32 %v2933_v14, %v2844_v49  ;;  %v4789_v31 = vpop.f32.mrb[77].mxu1  ;;  %v4806_v33 = vpop.f32.mrb[77].mxu0 }
 0xbd6   :  { %v3003_v34 = vpop.f32.mrb[78].mxu1 }
 0xbd7   :  { %v3017_v18 = vadd.f32 %v3003_v34, %v2924_v11  ;;  %v4817_v38 = vpop.f32.mrb[79].mxu1 }
 0xbd9   :  { %v3025_v4 = vadd.f32 %v4095_v36, %v3017_v18 }
 0xbda   :  { %v3008_v5 = vpop.f32.mrb[80].mxu1 }
 0xbdb   :  { %v4096_v7 = vmul.f32 -1.442695, %v3025_v4  ;;  %v3018_v9 = vadd.f32 %v3008_v5, %v2929_v47  ;;  %v4820_v10 = vpop.f32.mrb[81].mxu1 }
 0xbdd   :  { %5256 = vpow2.f32 %v4096_v7  ;;  %v3026_v30 = vadd.f32 %v4095_v36, %v3018_v9  ;;  %v4121_v7 = vld [vmem:[%s6419_s15 + $0x15] ss:$0 sm:$0xff] }
 0xbde   :  { %v3013_v39 = vpop.f32.mrb[82].mxu1 }
 0xbdf   :  { %v4097_v40 = vmul.f32 -1.442695, %v3026_v30  ;;  %v3019_v41 = vadd.f32 %v3013_v39, %v2934_v27  ;;  %v4823_v42 = vpop.f32.mrb[83].mxu1 }
 0xbe1   :  { %5258 = vpow2.f32 %v4097_v40  ;;  %v3027_v50 = vadd.f32 %v4095_v36, %v3019_v41 }
 0xbe2   :  { %v6264_v29 = vpop.f32.mrb[84].mxu1 }
 0xbe3   :  { %v4098_v46 = vmul.f32 -1.442695, %v3027_v50  ;;  %v4851_v61 = vpop.f32.mrb[85].mxu1 }
 0xbe5   :  { %5260 = vpow2.f32 %v4098_v46 }
 0xbe6   :  { %v6266_v54 = vpop.f32.mrb[86].mxu1 }
 0xbe7   :  { %v5257_v1 = vpop.eup %5256  ;;  %v4854_v52 = vpop.f32.mrb[87].mxu1 }
 0xbe8   :  { %v3037_v56 = vadd.f32 1.0, %v5257_v1 }
 0xbea   :  { %5262 = vrcp.f32 %v3037_v56  ;;  %v6268_v35 = vpop.f32.mrb[88].mxu1 }
 0xbeb   :  { %v5259_v60 = vpop.eup %5258  ;;  %v4857_v62 = vpop.f32.mrb[89].mxu1 }
 0xbec   :  { %v3038_v53 = vadd.f32 1.0, %v5259_v60 }
 0xbee   :  { %5264 = vrcp.f32 %v3038_v53  ;;  %v3408_v63 = vpop.f32.mrb[90].mxu1 }
 0xbef   :  { %v5261_v2 = vpop.eup %5260  ;;  %v4885_v3 = vpop.f32.mrb[91].mxu1 }
 0xbf0   :  { %v3039_v23 = vadd.f32 1.0, %v5261_v2 }
 0xbf2   :  { %5266 = vrcp.f32 %v3039_v23  ;;  %v3413_v12 = vpop.f32.mrb[92].mxu1 }
 0xbf3   :  { %v4888_v13 = vpop.f32.mrb[93].mxu1 }
 0xbf4   :  { %v5263_v17 = vpop.eup %5262 }
 0xbf5   :  { %v3046_v45 = vmul.f32 %v5263_v17, %v3025_v4  ;;  %v3919_v17 = vld [vmem:[%s6425_s5] ss:$0 sm:$0xff] }
 0xbf6   :  { %v3418_v11 = vpop.f32.mrb[94].mxu1  ;;  %vm371_vm3 = vcmp.eq.s32.totalorder %v5755_v43, %v3919_v17  ;;  %v4108_v43 = vld [vmem:[%s6419_s15 + $0x19] ss:$0 sm:$0xff] }
 0xbf7   :  { %4833 = vmatmul.mubr.msk.f32.vlgmr.msra.gmra.mrb[78].mxu0 %vm114_vm2, %v3046_v45  ;;  %v4891_v15 = vpop.f32.mrb[95].mxu1 }
 0xbf8   :  { %v5265_v16 = vpop.eup %5264  ;;  %4835 = vmatprep.mubr.msk.f32.mxu0 %vm5300_vm1, %v5301_v28  ;;  %5117 = vmatpush3.bf16.msra.mxu0 %v5116_v19  ;;  %v6339_v19 = vsel %vm371_vm3, 1.0, %v5301_v28 }
 0xbf9   :  { %v3047_v21 = vmul.f32 %v5265_v16, %v3026_v30  ;;  %5118 = vmatprep.subr.bf16.mxu0 %v5299_v24  ;;  %v374_v45 = vsel %vm373_vm0, %v6339_v19, 0.0 }
 0xbfa   :  { %375 = vadd.xlane.f32.xlu1 %v374_v45 }
 0xbfb   :  { %4836 = vmatmul.mubr.msk.f32.gmra.mrb[80].mxu0 %vm114_vm2, %v3047_v21 }
 0xbfc   :  { %v5267_v47 = vpop.eup %5266  ;;  %4838 = vmatprep.mubr.msk.f32.mxu0 %vm5300_vm1, %v5301_v28  ;;  %5120 = vmatpush3.bf16.msra.mxu0 %v5119_v20 }
 0xbfd   :  { %v3048_v48 = vmul.f32 %v5267_v47, %v3027_v50  ;;  %5127 = vmatprep.subr.bf16.mxu0 %v5299_v24 }
 0xbff   :  { %4839 = vmatmul.mubr.msk.f32.gmra.mrb[82].mxu0 %vm114_vm2, %v3048_v48 }
 0xc00   :  { %4866 = vmatprep.mubr.msk.f32.mxu0 %vm5300_vm1, %v5301_v28 }
 0xc03   :  { %4867 = vmatmul.mubr.msk.f32.vlgmr.msra.gmra.mrb[84].mxu0 %vm114_vm2, %v6152_v8  ;;  %v4126_v8 = vld [vmem:[%s6423_s11 + $0x48] sm:$0xff] }
 0xc04   :  { %4869 = vmatprep.mubr.msk.f32.mxu0 %vm5300_vm1, %v5301_v28  ;;  %v5128_v49 = vpack.c.bf16 %v4126_v8, %v4125_v55 }
 0xc06   :  { %5129 = vmatpush3.bf16.msra.mxu0 %v5128_v49 }
 0xc07   :  { %4870 = vmatmul.mubr.msk.f32.gmra.mrb[86].mxu0 %vm114_vm2, %v6167_v32  ;;  %5130 = vmatprep.subr.bf16.mxu0 %v5299_v24  ;;  %v4127_v32 = vld [vmem:[%s6423_s11 + $0x50] sm:$0xff] }
 0xc08   :  { %4872 = vmatprep.mubr.msk.f32.mxu0 %vm5300_vm1, %v5301_v28 }
 0xc0b   :  { %4873 = vmatmul.mubr.msk.f32.gmra.mrb[88].mxu0 %vm114_vm2, %v6183_v51  ;;  %v4128_v51 = vld [vmem:[%s6423_s11 + $0x58] sm:$0xff] }
 0xc0c   :  { %4900 = vmatprep.mubr.msk.f32.mxu0 %vm5300_vm1, %v5301_v28  ;;  %v5131_v14 = vpack.c.bf16 %v4128_v51, %v4127_v32 }
 0xc0e   :  { %5132 = vmatpush3.bf16.msra.mxu0 %v5131_v14 }
 0xc0f   :  { %5137 = vmatprep.subr.bf16.mxu0 %v5299_v24 }
 0xcca   :  { %v3134_v27 = vpop.f32.mrb[78].mxu0 }
 0xccb   :  { %v4834_v31 = vpop.f32.mrb[79].mxu0  ;;  %v3135_v44 = vadd.f32 %v4103_v59, %v3134_v27 }
 0xcce   :  { %v3139_v33 = vpop.f32.mrb[80].mxu0 }
 0xccf   :  { %v4837_v34 = vpop.f32.mrb[81].mxu0  ;;  %v3140_v16 = vadd.f32 %v4103_v59, %v3139_v33 }
 0xcd2   :  { %v3144_v36 = vpop.f32.mrb[82].mxu0 }
 0xcd3   :  { %v4840_v18 = vpop.f32.mrb[83].mxu0  ;;  %v3145_v47 = vadd.f32 %v4103_v59, %v3144_v36  ;;  %v4129_v36 = vld [vmem:[%s6419_s15 + $0x17] ss:$0 sm:$0xff] }
 0xcd6   :  { %v3328_v38 = vpop.f32.mrb[84].mxu0 }
 0xcd7   :  { %v3329_v4 = vadd.f32 %v3328_v38, %v6264_v29  ;;  %v4868_v5 = vpop.f32.mrb[85].mxu0 }
 0xcd9   :  { %v3422_v9 = vadd.f32 %v3408_v63, %v3329_v4 }
 0xcda   :  { %v3333_v10 = vpop.f32.mrb[86].mxu0 }
 0xcdb   :  { %v3430_v30 = vadd.f32 %v4121_v7, %v3422_v9  ;;  %v3334_v39 = vadd.f32 %v3333_v10, %v6266_v54  ;;  %v4871_v40 = vpop.f32.mrb[87].mxu0 }
 0xcdd   :  { %v4122_v41 = vmul.f32 -1.442695, %v3430_v30  ;;  %v3423_v42 = vadd.f32 %v3413_v12, %v3334_v39 }
 0xcde   :  { %v3338_v50 = vpop.f32.mrb[88].mxu0 }
 0xcdf   :  { %5268 = vpow2.f32 %v4122_v41  ;;  %v3431_v46 = vadd.f32 %v4121_v7, %v3423_v42  ;;  %v3339_v61 = vadd.f32 %v3338_v50, %v6268_v35  ;;  %v4874_v1 = vpop.f32.mrb[89].mxu0 }
 0xce1   :  { %v4123_v29 = vmul.f32 -1.442695, %v3431_v46  ;;  %v3424_v52 = vadd.f32 %v3418_v11, %v3339_v61  ;;  %v4107_v11 = vld [vmem:[%s6419_s15 + $0x18] ss:$0 sm:$0xff] }
 0xce2   :  { %v3153_v15 = vmul.f32 %v4107_v11, %v3135_v44  ;;  %v3154_v21 = vmul.f32 %v4107_v11, %v3140_v16  ;;  %v3155_v8 = vmul.f32 %v4107_v11, %v3145_v47 }
 0xce3   :  { %5270 = vpow2.f32 %v4123_v29  ;;  %v3432_v56 = vadd.f32 %v4121_v7, %v3424_v52  ;;  %v3725_v52 = vld [vmem:[%s6426_s12] sm:$0xff] }
 0xce4   :  { %v3161_v20 = vadd.f32 %v4108_v43, %v3153_v15  ;;  %v3162_v55 = vadd.f32 %v4108_v43, %v3154_v21  ;;  %v3163_v32 = vadd.f32 %v4108_v43, %v3155_v8  ;;  %v4139_v21 = vld [vmem:[%s6419_s15 + $0x3] ss:$0 sm:$0xff] }
 0xce5   :  { %v4124_v60 = vmul.f32 -1.442695, %v3432_v56 }
 0xce6   :  { %v4109_v48 = vmul.f32 -1.442695, %v3161_v20  ;;  %v4110_v49 = vmul.f32 -1.442695, %v3162_v55  ;;  %v4111_v51 = vmul.f32 -1.442695, %v3163_v32  ;;  %v21_v20 = vstv %s6428_s14 }
 0xce7   :  { %5272 = vpow2.f32 %v4124_v60  ;;  %v3727_v60 = vld [vmem:[%s6426_s12 + $0x10] sm:$0xff]  ;;  %22 = vst [vmem:[#allocation2] sm:$0x1] %v21_v20 }
 0xce9   :  { %v5269_v62 = vpop.eup %5268 }
 0xcea   :  { %v3442_v53 = vadd.f32 1.0, %v5269_v62 }
 0xcec   :  { %5274 = vrcp.f32 %v3442_v53 }
 0xced   :  { %v5271_v63 = vpop.eup %5270 }
 0xcee   :  { %v3443_v54 = vadd.f32 1.0, %v5271_v63  ;;  %v376_v63 = vpop.xlane.xlu1 %375 }
 0xcf0   :  { %5276 = vrcp.f32 %v3443_v54  ;;  %v377_v54 = vmax.f32 %v376_v63, 1.0 }
 0xcf1   :  { %v5273_v2 = vpop.eup %5272 }
 0xcf2   :  { %v3444_v3 = vadd.f32 1.0, %v5273_v2  ;;  %v4135_v2 = vld [vmem:[%s6419_s15 + $0x1a] ss:$0 sm:$0xff] }
 0xcf4   :  { %5278 = vrcp.f32 %v3444_v3 }
 0xcf5   :  { %5280 = vpow2.f32 %v4109_v48 }
 0xcf6   :  { %v5275_v23 = vpop.eup %5274  ;;  %5282 = vpow2.f32 %v4110_v49 }
 0xcf7   :  { %v3451_v6 = vmul.f32 %v5275_v23, %v3430_v30  ;;  %5284 = vpow2.f32 %v4111_v51 }
 0xcf9   :  { %4901 = vmatmul.mubr.msk.f32.vlgmr.msra.gmra.mrb[90].mxu0 %vm114_vm2, %v3451_v6 }
 0xcfa   :  { %v5277_v35 = vpop.eup %5276  ;;  %4903 = vmatprep.mubr.msk.f32.mxu0 %vm5300_vm1, %v5301_v28 }
 0xcfb   :  { %v3452_v58 = vmul.f32 %v5277_v35, %v3431_v46  ;;  %v4136_v35 = vld [vmem:[%s6419_s15 + $0x1b] ss:$0 sm:$0xff] }
 0xcfd   :  { %4904 = vmatmul.mubr.msk.f32.gmra.mrb[92].mxu0 %vm114_vm2, %v3452_v58 }
 0xcfe   :  { %v5279_v12 = vpop.eup %5278  ;;  %4906 = vmatprep.mubr.msk.f32.mxu0 %vm5300_vm1, %v5301_v28 }
 0xcff   :  { %v3453_v13 = vmul.f32 %v5279_v12, %v3432_v56  ;;  %v5281_v14 = vpop.eup %5280  ;;  %v3726_v56 = vld [vmem:[%s6426_s12 + $0x8] sm:$0xff] }
 0xd00   :  { %v3173_v27 = vadd.f32 1.0, %v5281_v14  ;;  %v5283_v31 = vpop.eup %5282  ;;  %v5142_v62 = vpack.c.bf16 %v3726_v56, %v3725_v52 }
 0xd01   :  { %4907 = vmatmul.mubr.msk.f32.gmra.mrb[94].mxu0 %vm114_vm2, %v3453_v13  ;;  %v3174_v33 = vadd.f32 1.0, %v5283_v31  ;;  %v5285_v34 = vpop.eup %5284 }
 0xd02   :  { %4922 = vmatprep.mubr.msk.f32.mxu0 %vm5300_vm1, %v5301_v28  ;;  %5286 = vrcp.f32 %v3173_v27  ;;  %v3175_v18 = vadd.f32 1.0, %v5285_v34 }
 0xd03   :  { %5288 = vrcp.f32 %v3174_v33 }
 0xd04   :  { %5290 = vrcp.f32 %v3175_v18  ;;  %v4142_v18 = vld [vmem:[#allocation2] ss:$0 sm:$0xff] }
 0xd05   :  { %5292 = vrcp.f32 %v377_v54 }
 0xd0c   :  { %v5287_v7 = vpop.eup %5286 }
 0xd0d   :  { %v5289_v40 = vpop.eup %5288 }
 0xd0e   :  { %v5291_v1 = vpop.eup %5290 }
 0xd0f   :  { %v5293_v44 = vpop.eup %5292 }
 0xd10   :  { %v379_v16 = vmul.f32 %v5293_v44, %v6339_v19  ;;  %v3820_v19 = vld [vmem:[%s6427_s13 + $0x18] sm:$0xff] }
 0xdcc   :  { %v3539_v38 = vpop.f32.mrb[90].mxu0 }
 0xdcd   :  { %v3540_v4 = vadd.f32 %v4129_v36, %v3539_v38  ;;  %v4902_v5 = vpop.f32.mrb[91].mxu0 }
 0xdcf   :  { %v3553_v9 = vmul.f32 %v5287_v7, %v3540_v4 }
 0xdd0   :  { %v3544_v10 = vpop.f32.mrb[92].mxu0 }
 0xdd1   :  { %v3545_v30 = vadd.f32 %v4129_v36, %v3544_v10  ;;  %v4905_v39 = vpop.f32.mrb[93].mxu0 }
 0xdd3   :  { %v3554_v41 = vmul.f32 %v5289_v40, %v3545_v30 }
 0xdd4   :  { %v3549_v42 = vpop.f32.mrb[94].mxu0 }
 0xdd5   :  { %v3550_v50 = vadd.f32 %v4129_v36, %v3549_v42  ;;  %v4908_v46 = vpop.f32.mrb[95].mxu0  ;;  %v5133_v61 = vpack.c.bf16 %v3554_v41, %v3553_v9 }
 0xdd7   :  { %v3555_v29 = vmul.f32 %v5291_v1, %v3550_v50  ;;  %5134 = vmatprep.subr.bf16.mxu1 %v5133_v61 }
 0xdd8   :  { %5136 = vmatpush3.bf16.msra.mxu1 %v5133_v61 }
 0xdd9   :  { %4913 = vmatprep.subr.mxu1 %v3555_v29 }
 0xddc   :  { %4914 = vmatpush3.msra.mxu1 %v3555_v29 }
 0xddd   :  { %4916 = vmatmul.mubr.msk.f32.vlgmr.msra.gmra.mrb[96].mxu1 %vm1391_vm14, %v5780_v37  ;;  %5141 = vmatprep.subr.bf16.mxu1 %v5299_v24  ;;  %v3728_v37 = vld [vmem:[%s6426_s12 + $0x18] sm:$0xff] }
 0xdde   :  { %4933 = vmatprep.mubr.msk.f32.mxu1 %vm5300_vm1, %v5301_v28  ;;  %5143 = vmatpush3.bf16.msra.mxu1 %v5142_v62  ;;  %v5145_v53 = vpack.c.bf16 %v3728_v37, %v3727_v60 }
 0xddf   :  { %5144 = vmatprep.subr.bf16.mxu1 %v5299_v24 }
 0xde2   :  { %5146 = vmatpush3.bf16.msra.mxu1 %v5145_v53 }
 0xeb0   :  { %v4917_v3 = vpop.f32.mrb[96].mxu1 }
 0xeb1   :  { %v3637_v23 = vmul.f32 %v4917_v3, %v4135_v2  ;;  %v3622_v6 = vpop.f32.mrb[97].mxu1 }
 0xeb2   :  { %v3636_v58 = vmul.f32 %v4135_v2, %v3622_v6 }
 0xeb3   :  { %v3639_v12 = vadd.f32 %v3637_v23, %v2569_v57  ;;  %v3817_v57 = vld [vmem:[%s6427_s13] sm:$0xff] }
 0xeb4   :  { %v3638_v13 = vadd.f32 %v3636_v58, %v2568_v26  ;;  %v5148_v26 = vpack.c.bf16 %v3818_v0, %v3817_v57 }
 0xeb5   :  { %v3646_v17 = vadd.f32 %v4136_v35, %v3639_v12 }
 0xeb6   :  { %v3645_v45 = vadd.f32 %v4136_v35, %v3638_v13 }
 0xeb7   :  { %v3648_v59 = vmax.f32 %v3646_v17, 0.0 }
 0xeb8   :  { %v3647_v11 = vmax.f32 %v3645_v45, 0.0 }
 0xeba   :  { %v5138_v15 = vpack.c.bf16 %v3648_v59, %v3647_v11 }
 0xebc   :  { %5140 = vmatpush3.bf16.msk.msra.mxu0 %vm5469_vm5, %v5138_v15 }
 0xebd   :  { %5147 = vmatprep.subr.bf16.mxu0 %v5299_v24 }
 0xebf   :  { %4923 = vmatmul.mubr.msk.f32.vlgmr.msra.gmra.mrb[96].mxu0 %vm380_vm8, %v379_v16 }
 0xec0   :  { %4944 = vmatprep.mubr.msk.f32.mxu0 %vm5300_vm1, %v5301_v28  ;;  %5149 = vmatpush3.bf16.msra.mxu0 %v5148_v26  ;;  %v3819_v28 = vld [vmem:[%s6427_s13 + $0x10] sm:$0xff]  ;;  %vm3901_vm1 = vcmask 1024  }
 0xec1   :  { %5150 = vmatprep.subr.bf16.mxu0 %v5299_v24  ;;  %v5151_v43 = vpack.c.bf16 %v3820_v19, %v3819_v28 }
 0xec4   :  { %5152 = vmatpush3.bf16.msra.mxu0 %v5151_v43 }
 0xf92   :  { %v3721_v22 = vpop.f32.mrb[96].mxu0 }
 0xf93   :  { %4934 = vmatmul.mubr.msk.f32.vlgmr.msra.gmra.mrb[98].mxu1 %vm114_vm2, %v3721_v22  ;;  %v4924_v25 = vpop.f32.mrb[97].mxu0 }
0x1066   :  { %v3803_v24 = vpop.f32.mrb[98].mxu1 }
0x1067   :  { %v3804_v47 = vadd.f32 %v4139_v21, %v3803_v24  ;;  %v4935_v48 = vpop.f32.mrb[99].mxu1 }
0x1069   :  { %v3808_v55 = vand.u32 2147483647, %v3804_v47  ;;  %v3807_v27 = vmax.f32 %v3804_v47, 0.0 }
0x106b   :  { %v3809_v8 = vsub.f32 0.0, %v3808_v55 }
0x106d   :  { %v3810_v49 = vmul.f32 1.442695, %v3809_v8 }
0x106f   :  { %5294 = vpow2.f32 %v3810_v49 }
0x1079   :  { %v5295_v32 = vpop.eup %5294 }
0x107a   :  { %v3812_v51 = vadd.f32 1.0, %v5295_v32 }
0x107c   :  { %5296 = vlog2.f32 %v3812_v51 }
0x1086   :  { %v5297_v14 = vpop.eup %5296 }
0x1087   :  { %v3814_v31 = vmul.f32 0.6931472, %v5297_v14 }
0x1089   :  { %v3815_v33 = vadd.f32 %v3814_v31, %v3807_v27 }
0x108b   :  { %v4141_v34 = vadd.f32 -0.6931472, %v3815_v33 }
0x108d   :  { %4945 = vmatmul.mubr.msk.f32.vlgmr.msra.gmra.mrb[98].mxu0 %vm114_vm2, %v4141_v34 }
0x1160   :  { %v3897_v36 = vpop.f32.mrb[98].mxu0 }
0x1161   :  { %v3898_v38 = vadd.f32 %v4142_v18, %v3897_v36  ;;  %v4946_v4 = vpop.f32.mrb[99].mxu0 }
0x1163   :  { %3902 = vst.msk [vmem:[%s6429_s16] sm:$0x3] %vm3901_vm1, %v3898_v38 }

</bundles_post_ra>
